<compile_context>
chip_gen: v6e
topology: v6e:2x2x1
jax: 0.10.0
libtpu: 0.0.40
codegen_flags: <defaults>
</compile_context>

<pallas_src>
import numpy as np
import jax
import jax.numpy as jnp
from jax.experimental import pallas as pl
from jax.experimental.pallas import tpu as pltpu

_EPS = 1e-5                     # nn.LayerNorm default eps
_INV_SQRT2 = 0.7071067811865475


def _make_aspp_kernel(rates, cin, cout, h, hp, hwp, padf):
    """Build the ASPP kernel for a fixed configuration."""
    n_rates = len(rates)
    inv_n7 = 1.0 / float(h * h * cout)   # LayerNorm([C,7,7]) element count
    inv_nc = 1.0 / float(cout)           # LayerNorm([C,1,1]) element count
    inv_hw = 1.0 / float(h * h)          # global average pool

    # flat-grid offsets of the 9 taps of a dilated 3x3 conv, per rate
    tap_offsets = [
        [(dy * r) * hp + (dx * r) for dy in (-1, 0, 1) for dx in (-1, 0, 1)]
        for r in rates
    ]

    def kernel(x_ref, mask_ref, w0_ref, wr_ref, wp_ref, wpr_ref,
               g_ref, b_ref, gp_ref, bp_ref, out_ref):
        mask = mask_ref[...]                           # (1, hwp) interior mask
        x = x_ref[0].astype(jnp.float32)               # (cin, P)  flat-padded input
        x_c = x[:, padf:padf + hwp]                    # (cin, hwp) central window

        def ln7_gelu(hpre, g, b):
            # LayerNorm over (C,7,7) + exact GELU.  Border columns of hpre are zero
            # and g/b are zero-padded on the border, so the border stays zero.
            mu = jnp.sum(hpre) * inv_n7
            var = jnp.sum(hpre * hpre) * inv_n7 - mu * mu
            y = (hpre - mu) * jax.lax.rsqrt(var + _EPS) * g + b
            return 0.5 * y * (1.0 + jax.lax.erf(y * _INV_SQRT2))

        branches = []

        # ---- branch 0: 1x1 conv (border cols of x_c are zero -> no mask needed)
        h0 = jnp.dot(w0_ref[...], x_c, preferred_element_type=jnp.float32)
        branches.append(ln7_gelu(h0, g_ref[0], b_ref[0]))

        # ---- dilated 3x3 branches: single im2col matmul per branch
        for bi in range(n_rates):
            patch = jnp.concatenate(
                [x[:, padf + off:padf + off + hwp] for off in tap_offsets[bi]],
                axis=0)                                            # (9*cin, hwp)
            hb = jnp.dot(wr_ref[bi], patch, preferred_element_type=jnp.float32)
            hb = hb * mask          # zero the wrapped / spurious border columns
            branches.append(ln7_gelu(hb, g_ref[1 + bi], b_ref[1 + bi]))

        # ---- global-average-pooling branch
        # conv1x1(mean(x)) == mean(conv1x1(x))  (linearity); border cols are zero.
        tmp = jnp.dot(wp_ref[...], x_c, preferred_element_type=jnp.float32)
        hpool = jnp.sum(tmp, axis=1, keepdims=True) * inv_hw       # (cout, 1)
        mu_p = jnp.sum(hpool) * inv_nc
        var_p = jnp.sum(hpool * hpool) * inv_nc - mu_p * mu_p
        yp = (hpool - mu_p) * jax.lax.rsqrt(var_p + _EPS) * gp_ref[...] + bp_ref[...]
        yp = 0.5 * yp * (1.0 + jax.lax.erf(yp * _INV_SQRT2))       # (cout, 1)
        # bilinear upsample 1x1 -> 7x7 == broadcast over the interior columns
        branches.append(yp * mask)                                 # (cout, hwp)

        # ---- concat + 1x1 projection + LayerNorm + GELU
        # TODO(synk): Dropout(0.5) is implemented as identity (eval-mode forward).
        cat = jnp.concatenate(branches, axis=0)                    # (nb*cout, hwp)
        hpr = jnp.dot(wpr_ref[...], cat, preferred_element_type=jnp.float32)
        out_ref[0] = ln7_gelu(hpr, g_ref[1 + n_rates],
                              b_ref[1 + n_rates]).astype(out_ref.dtype)

    return kernel


def aspp_forward(x, w0, wr_list, wp, wproj, g_list, b_list, gp, bp, rates):
    """ASPP forward.

    x       : (N, Cin, 7, 7)  NCHW
    w0, wp  : (Cin, Cout)            1x1-conv weights (torch OIHW transposed)
    wr_list : list of (3,3,Cin,Cout) HWIO 3x3-conv weights, one per atrous rate
    wproj   : (nb*Cout, Cout)        projection 1x1-conv weight
    g_list/b_list : nb arrays (Cout,7,7) CHW LayerNorm affines
                    (order: branch0, each rate branch, projection)
    gp, bp  : (Cout,)                pooling-branch LayerNorm affine
    """
    n, cin, h, w = x.shape
    assert h == w
    cout = w0.shape[1]
    n_rates = len(rates)
    nb = n_rates + 2
    r_max = max(rates)
    hp = h + 2 * r_max
    hwp = hp * hp
    padf = r_max * hp + r_max
    p_flat = hwp + 2 * padf

    # ---- glue: NCHW -> spatial zero-pad -> flatten row-major -> flat front/back pad
    xp = jnp.pad(x.astype(jnp.float32),
                 ((0, 0), (0, 0), (r_max, r_max), (r_max, r_max)))
    xb = jnp.pad(xp.reshape(n, cin, hwp), ((0, 0), (0, 0), (padf, padf)))

    # ---- interior mask of the padded grid, built once on the host
    mask_np = np.zeros((hp, hp), np.float32)
    mask_np[r_max:r_max + h, r_max:r_max + w] = 1.0
    mask_arr = jnp.asarray(mask_np.reshape(1, hwp))

    # ---- weights pre-transposed for the (C, HW) layout matmuls
    w0t = jnp.transpose(w0).astype(jnp.float32)                         # (cout, cin)
    wrt = jnp.stack([jnp.transpose(wr_list[i].reshape(9 * cin, cout))
                     for i in range(n_rates)]).astype(jnp.float32)      # (nr,cout,9cin)
    wpt = jnp.transpose(wp).astype(jnp.float32)                         # (cout, cin)
    wprt = jnp.transpose(wproj).astype(jnp.float32)                     # (cout, nb*cout)

    def pad_affine(a):   # (cout, 7, 7) -> (cout, hwp) with zeroed border
        return jnp.pad(a, ((0, 0), (r_max, r_max), (r_max, r_max))).reshape(cout, hwp)

    g_stack = jnp.stack([pad_affine(g) for g in g_list]).astype(jnp.float32)
    b_stack = jnp.stack([pad_affine(b) for b in b_list]).astype(jnp.float32)
    gp2 = gp.reshape(cout, 1).astype(jnp.float32)
    bp2 = bp.reshape(cout, 1).astype(jnp.float32)

    kernel = _make_aspp_kernel(rates, cin, cout, h, hp, hwp, padf)

    out_flat = pl.pallas_call(
        kernel,
        out_shape=jax.ShapeDtypeStruct((n, cout, hwp), jnp.float32),
        grid_spec=pltpu.PrefetchScalarGridSpec(
            num_scalar_prefetch=0,
            grid=(n,),
            in_specs=[
                pl.BlockSpec((1, cin, p_flat), lambda i: (i, 0, 0)),       # x
                pl.BlockSpec((1, hwp), lambda i: (0, 0)),                  # mask
                pl.BlockSpec((cout, cin), lambda i: (0, 0)),               # w0^T
                pl.BlockSpec((n_rates, cout, 9 * cin), lambda i: (0, 0, 0)),  # wr^T
                pl.BlockSpec((cout, cin), lambda i: (0, 0)),               # wp^T
                pl.BlockSpec((cout, nb * cout), lambda i: (0, 0)),         # wproj^T
                pl.BlockSpec((nb, cout, hwp), lambda i: (0, 0, 0)),        # LN gammas
                pl.BlockSpec((nb, cout, hwp), lambda i: (0, 0, 0)),        # LN betas
                pl.BlockSpec((cout, 1), lambda i: (0, 0)),                 # pool gamma
                pl.BlockSpec((cout, 1), lambda i: (0, 0)),                 # pool beta
            ],
            out_specs=pl.BlockSpec((1, cout, hwp), lambda i: (i, 0, 0)),
        ),
        compiler_params=pltpu.CompilerParams(dimension_semantics=("parallel",)),
    )(xb, mask_arr, w0t, wrt, wpt, wprt, g_stack, b_stack, gp2, bp2)

    # output is already channel-major (NCHW-ordered): just un-flatten and crop
    out = out_flat.reshape(n, cout, hp, hp)[:, :, r_max:r_max + h, r_max:r_max + w]
    return out


def aspp_reference(x, w0, wr_list, wp, wproj, g_list, b_list, gp, bp, rates):
    """Pure-JAX reference matching the PyTorch ASPP forward (eval mode)."""
    n, cin, h, w = x.shape
    cout = w0.shape[1]
    hi = jax.lax.Precision.HIGHEST
    xh = jnp.transpose(x, (0, 2, 3, 1)).astype(jnp.float32)      # NHWC

    def ln7_gelu(y, g_chw, b_chw):
        mu = jnp.mean(y, axis=(1, 2, 3), keepdims=True)
        var = jnp.mean((y - mu) ** 2, axis=(1, 2, 3), keepdims=True)
        g = jnp.transpose(g_chw, (1, 2, 0))[None]
        b = jnp.transpose(b_chw, (1, 2, 0))[None]
        yn = (y - mu) * jax.lax.rsqrt(var + _EPS) * g + b
        return jax.nn.gelu(yn, approximate=False)

    branches = [ln7_gelu(jnp.einsum('nhwc,cd->nhwd', xh, w0, precision=hi),
                         g_list[0], b_list[0])]
    for i, r in enumerate(rates):
        yb = jax.lax.conv_general_dilated(
            xh, wr_list[i], window_strides=(1, 1), padding=[(r, r), (r, r)],
            rhs_dilation=(r, r), dimension_numbers=('NHWC', 'HWIO', 'NHWC'),
            precision=hi)
        branches.append(ln7_gelu(yb, g_list[1 + i], b_list[1 + i]))

    xm = jnp.mean(xh, axis=(1, 2))                               # (N, cin)
    yp = jnp.dot(xm, wp, precision=hi)                           # (N, cout)
    mu = jnp.mean(yp, axis=1, keepdims=True)
    var = jnp.mean((yp - mu) ** 2, axis=1, keepdims=True)
    yp = (yp - mu) * jax.lax.rsqrt(var + _EPS) * gp[None] + bp[None]
    yp = jax.nn.gelu(yp, approximate=False)
    branches.append(jnp.broadcast_to(yp[:, None, None, :], (n, h, w, cout)))

    cat = jnp.concatenate(branches, axis=-1)                     # (N,H,W, nb*cout)
    ypr = ln7_gelu(jnp.einsum('nhwc,cd->nhwd', cat, wproj, precision=hi),
                   g_list[-1], b_list[-1])
    return jnp.transpose(ypr, (0, 3, 1, 2))                      # NCHW


if __name__ == "__main__":
    key = jax.random.PRNGKey(0)
    N, Cin, Cout, H = 2, 4, 8, 7          # spatial 7x7 fixed by LayerNorm([C,7,7])
    rates = (1, 2, 3)
    nb = len(rates) + 2                   # 1x1 branch + rate branches + pooling

    keys = jax.random.split(key, 32)
    ki = iter(range(32))

    x = jax.random.normal(keys[next(ki)], (N, Cin, H, H), jnp.float32)

    w0 = jax.random.normal(keys[next(ki)], (Cin, Cout), jnp.float32) / np.sqrt(Cin)
    wr_list = [jax.random.normal(keys[next(ki)], (3, 3, Cin, Cout), jnp.float32)
               / np.sqrt(9 * Cin) for _ in rates]
    wp = jax.random.normal(keys[next(ki)], (Cin, Cout), jnp.float32) / np.sqrt(Cin)
    wproj = jax.random.normal(keys[next(ki)], (nb * Cout, Cout), jnp.float32) \
        / np.sqrt(nb * Cout)

    g_list, b_list = [], []
    for _ in range(nb):  # branch0, rate branches, projection LayerNorms
        g_list.append(1.0 + 0.1 * jax.random.normal(keys[next(ki)], (Cout, H, H),
                                                    jnp.float32))
        b_list.append(0.1 * jax.random.normal(keys[next(ki)], (Cout, H, H),
                                              jnp.float32))
    gp = 1.0 + 0.1 * jax.random.normal(keys[next(ki)], (Cout,), jnp.float32)
    bp = 0.1 * jax.random.normal(keys[next(ki)], (Cout,), jnp.float32)

    out = aspp_forward(x, w0, wr_list, wp, wproj, g_list, b_list, gp, bp, rates)
    out = jax.block_until_ready(out)

    ref = jax.block_until_ready(
        aspp_reference(x, w0, wr_list, wp, wproj, g_list, b_list, gp, bp, rates))

    assert out.shape == (N, Cout, H, H), out.shape
    np.testing.assert_allclose(np.asarray(out), np.asarray(ref), atol=2e-4, rtol=2e-4)
    print("KERNEL_OK")
</pallas_src>

<mosaic_0001>
module attributes {stable_mosaic.version = 11 : i64} {
  func.func @kernel(%arg0: i32, %arg1: memref<1x4x253xf32, #tpu.memory_space<vmem>>, %arg2: memref<1x169xf32, #tpu.memory_space<vmem>>, %arg3: memref<8x4xf32, #tpu.memory_space<vmem>>, %arg4: memref<3x8x36xf32, #tpu.memory_space<vmem>>, %arg5: memref<8x4xf32, #tpu.memory_space<vmem>>, %arg6: memref<8x40xf32, #tpu.memory_space<vmem>>, %arg7: memref<5x8x169xf32, #tpu.memory_space<vmem>>, %arg8: memref<5x8x169xf32, #tpu.memory_space<vmem>>, %arg9: memref<8x1xf32, #tpu.memory_space<vmem>>, %arg10: memref<8x1xf32, #tpu.memory_space<vmem>>, %arg11: memref<1x8x169xf32, #tpu.memory_space<vmem>>) attributes {dimension_semantics = [#tpu.dimension_semantics<parallel>], iteration_bounds = array<i64: 2>, scalar_prefetch = 0 : i64, scratch_operands = 0 : i64, tpu.core_type = #tpu.core_type<tc>, window_params = [{transform_indices = @transform_0, window_bounds = array<i64: 1, 4, 253>}, {pipeline_mode = #tpu.pipeline_mode<synchronous>, transform_indices = @transform_1, window_bounds = array<i64: 1, 169>}, {pipeline_mode = #tpu.pipeline_mode<synchronous>, transform_indices = @transform_2, window_bounds = array<i64: 8, 4>}, {pipeline_mode = #tpu.pipeline_mode<synchronous>, transform_indices = @transform_3, window_bounds = array<i64: 3, 8, 36>}, {pipeline_mode = #tpu.pipeline_mode<synchronous>, transform_indices = @transform_4, window_bounds = array<i64: 8, 4>}, {pipeline_mode = #tpu.pipeline_mode<synchronous>, transform_indices = @transform_5, window_bounds = array<i64: 8, 40>}, {pipeline_mode = #tpu.pipeline_mode<synchronous>, transform_indices = @transform_6, window_bounds = array<i64: 5, 8, 169>}, {pipeline_mode = #tpu.pipeline_mode<synchronous>, transform_indices = @transform_7, window_bounds = array<i64: 5, 8, 169>}, {pipeline_mode = #tpu.pipeline_mode<synchronous>, transform_indices = @transform_8, window_bounds = array<i64: 8, 1>}, {pipeline_mode = #tpu.pipeline_mode<synchronous>, transform_indices = @transform_9, window_bounds = array<i64: 8, 1>}, {transform_indices = @transform_10, window_bounds = array<i64: 1, 8, 169>}]} {
    %c0 = arith.constant 0 : index
    %c0_0 = arith.constant 0 : index
    %0 = vector.load %arg2[%c0, %c0_0] : memref<1x169xf32, #tpu.memory_space<vmem>>, vector<1x169xf32>
    %c0_1 = arith.constant 0 : index
    %c0_2 = arith.constant 0 : index
    %c0_3 = arith.constant 0 : index
    %1 = vector.load %arg1[%c0_1, %c0_2, %c0_3] : memref<1x4x253xf32, #tpu.memory_space<vmem>>, vector<1x4x253xf32>
    %2 = vector.shape_cast %1 : vector<1x4x253xf32> to vector<4x253xf32>
    %3 = vector.extract_strided_slice %2 {offsets = [0, 42], sizes = [4, 169], strides = [1, 1]} : vector<4x253xf32> to vector<4x169xf32>
    %c0_4 = arith.constant 0 : index
    %c0_5 = arith.constant 0 : index
    %4 = vector.load %arg3[%c0_4, %c0_5] : memref<8x4xf32, #tpu.memory_space<vmem>>, vector<8x4xf32>
    %cst = arith.constant dense<0.000000e+00> : vector<8x169xf32>
    %5 = tpu.matmul %4, %3, %cst {dimension_numbers = #tpu.dot_dimension_numbers<[1], [0], [0], [1], [0, 0, 1, 1], [], []>} : vector<8x4xf32>, vector<4x169xf32>, vector<8x169xf32> -> vector<8x169xf32>
    %c0_6 = arith.constant 0 : index
    %c0_7 = arith.constant 0 : index
    %c0_8 = arith.constant 0 : index
    %6 = vector.load %arg7[%c0_6, %c0_7, %c0_8] : memref<5x8x169xf32, #tpu.memory_space<vmem>>, vector<1x8x169xf32>
    %7 = vector.shape_cast %6 : vector<1x8x169xf32> to vector<8x169xf32>
    %c0_9 = arith.constant 0 : index
    %c0_10 = arith.constant 0 : index
    %c0_11 = arith.constant 0 : index
    %8 = vector.load %arg8[%c0_9, %c0_10, %c0_11] : memref<5x8x169xf32, #tpu.memory_space<vmem>>, vector<1x8x169xf32>
    %9 = vector.shape_cast %8 : vector<1x8x169xf32> to vector<8x169xf32>
    %10 = vector.shape_cast %5 : vector<8x169xf32> to vector<1x8x169xf32>
    %cst_12 = arith.constant dense<0.000000e+00> : vector<1xf32>
    %11 = vector.multi_reduction <add>, %10, %cst_12 [1, 2] : vector<1x8x169xf32> to vector<1xf32>
    %12 = vector.shape_cast %11 : vector<1xf32> to vector<1x1x1xf32>
    %13 = vector.extract %12[0, 0, 0] : f32 from vector<1x1x1xf32>
    %cst_13 = arith.constant 0.00255102036 : f32
    %14 = arith.mulf %13, %cst_13 : f32
    %15 = arith.mulf %5, %5 : vector<8x169xf32>
    %16 = vector.shape_cast %15 : vector<8x169xf32> to vector<1x8x169xf32>
    %cst_14 = arith.constant dense<0.000000e+00> : vector<1xf32>
    %17 = vector.multi_reduction <add>, %16, %cst_14 [1, 2] : vector<1x8x169xf32> to vector<1xf32>
    %18 = vector.shape_cast %17 : vector<1xf32> to vector<1x1x1xf32>
    %19 = vector.extract %18[0, 0, 0] : f32 from vector<1x1x1xf32>
    %cst_15 = arith.constant 0.00255102036 : f32
    %20 = arith.mulf %19, %cst_15 : f32
    %21 = arith.mulf %14, %14 : f32
    %22 = arith.subf %20, %21 : f32
    %23 = vector.broadcast %14 : f32 to vector<8x169xf32>
    %24 = arith.subf %5, %23 : vector<8x169xf32>
    %cst_16 = arith.constant 9.99999974E-6 : f32
    %25 = arith.addf %22, %cst_16 : f32
    %26 = math.rsqrt %25 : f32
    %27 = vector.broadcast %26 : f32 to vector<8x169xf32>
    %28 = arith.mulf %24, %27 : vector<8x169xf32>
    %29 = arith.mulf %28, %7 : vector<8x169xf32>
    %30 = arith.addf %29, %9 : vector<8x169xf32>
    %cst_17 = arith.constant 5.000000e-01 : f32
    %31 = vector.broadcast %cst_17 : f32 to vector<8x169xf32>
    %32 = arith.mulf %31, %30 : vector<8x169xf32>
    %cst_18 = arith.constant 0.707106769 : f32
    %33 = vector.broadcast %cst_18 : f32 to vector<8x169xf32>
    %34 = arith.mulf %30, %33 : vector<8x169xf32>
    %35 = math.erf %34 : vector<8x169xf32>
    %cst_19 = arith.constant 1.000000e+00 : f32
    %36 = vector.broadcast %cst_19 : f32 to vector<8x169xf32>
    %37 = arith.addf %36, %35 : vector<8x169xf32>
    %38 = arith.mulf %32, %37 : vector<8x169xf32>
    %39 = vector.extract_strided_slice %2 {offsets = [0, 28], sizes = [4, 169], strides = [1, 1]} : vector<4x253xf32> to vector<4x169xf32>
    %40 = vector.extract_strided_slice %2 {offsets = [0, 29], sizes = [4, 169], strides = [1, 1]} : vector<4x253xf32> to vector<4x169xf32>
    %41 = vector.extract_strided_slice %2 {offsets = [0, 30], sizes = [4, 169], strides = [1, 1]} : vector<4x253xf32> to vector<4x169xf32>
    %42 = vector.extract_strided_slice %2 {offsets = [0, 41], sizes = [4, 169], strides = [1, 1]} : vector<4x253xf32> to vector<4x169xf32>
    %43 = vector.extract_strided_slice %2 {offsets = [0, 42], sizes = [4, 169], strides = [1, 1]} : vector<4x253xf32> to vector<4x169xf32>
    %44 = vector.extract_strided_slice %2 {offsets = [0, 43], sizes = [4, 169], strides = [1, 1]} : vector<4x253xf32> to vector<4x169xf32>
    %45 = vector.extract_strided_slice %2 {offsets = [0, 54], sizes = [4, 169], strides = [1, 1]} : vector<4x253xf32> to vector<4x169xf32>
    %46 = vector.extract_strided_slice %2 {offsets = [0, 55], sizes = [4, 169], strides = [1, 1]} : vector<4x253xf32> to vector<4x169xf32>
    %47 = vector.extract_strided_slice %2 {offsets = [0, 56], sizes = [4, 169], strides = [1, 1]} : vector<4x253xf32> to vector<4x169xf32>
    %48 = tpu.concatenate %39, %40, %41, %42, %43, %44, %45, %46, %47 in 0 : vector<4x169xf32>, vector<4x169xf32>, vector<4x169xf32>, vector<4x169xf32>, vector<4x169xf32>, vector<4x169xf32>, vector<4x169xf32>, vector<4x169xf32>, vector<4x169xf32> -> vector<36x169xf32>
    %c0_20 = arith.constant 0 : index
    %c0_21 = arith.constant 0 : index
    %c0_22 = arith.constant 0 : index
    %49 = vector.load %arg4[%c0_20, %c0_21, %c0_22] : memref<3x8x36xf32, #tpu.memory_space<vmem>>, vector<1x8x36xf32>
    %50 = vector.shape_cast %49 : vector<1x8x36xf32> to vector<8x36xf32>
    %cst_23 = arith.constant dense<0.000000e+00> : vector<8x169xf32>
    %51 = tpu.matmul %50, %48, %cst_23 {dimension_numbers = #tpu.dot_dimension_numbers<[1], [0], [0], [1], [0, 0, 1, 1], [], []>} : vector<8x36xf32>, vector<36x169xf32>, vector<8x169xf32> -> vector<8x169xf32>
    %52 = vector.broadcast %0 : vector<1x169xf32> to vector<8x169xf32>
    %53 = arith.mulf %51, %52 : vector<8x169xf32>
    %c1 = arith.constant 1 : index
    %c0_24 = arith.constant 0 : index
    %c0_25 = arith.constant 0 : index
    %54 = vector.load %arg7[%c1, %c0_24, %c0_25] : memref<5x8x169xf32, #tpu.memory_space<vmem>>, vector<1x8x169xf32>
    %55 = vector.shape_cast %54 : vector<1x8x169xf32> to vector<8x169xf32>
    %c1_26 = arith.constant 1 : index
    %c0_27 = arith.constant 0 : index
    %c0_28 = arith.constant 0 : index
    %56 = vector.load %arg8[%c1_26, %c0_27, %c0_28] : memref<5x8x169xf32, #tpu.memory_space<vmem>>, vector<1x8x169xf32>
    %57 = vector.shape_cast %56 : vector<1x8x169xf32> to vector<8x169xf32>
    %58 = vector.shape_cast %53 : vector<8x169xf32> to vector<1x8x169xf32>
    %cst_29 = arith.constant dense<0.000000e+00> : vector<1xf32>
    %59 = vector.multi_reduction <add>, %58, %cst_29 [1, 2] : vector<1x8x169xf32> to vector<1xf32>
    %60 = vector.shape_cast %59 : vector<1xf32> to vector<1x1x1xf32>
    %61 = vector.extract %60[0, 0, 0] : f32 from vector<1x1x1xf32>
    %cst_30 = arith.constant 0.00255102036 : f32
    %62 = arith.mulf %61, %cst_30 : f32
    %63 = arith.mulf %53, %53 : vector<8x169xf32>
    %64 = vector.shape_cast %63 : vector<8x169xf32> to vector<1x8x169xf32>
    %cst_31 = arith.constant dense<0.000000e+00> : vector<1xf32>
    %65 = vector.multi_reduction <add>, %64, %cst_31 [1, 2] : vector<1x8x169xf32> to vector<1xf32>
    %66 = vector.shape_cast %65 : vector<1xf32> to vector<1x1x1xf32>
    %67 = vector.extract %66[0, 0, 0] : f32 from vector<1x1x1xf32>
    %cst_32 = arith.constant 0.00255102036 : f32
    %68 = arith.mulf %67, %cst_32 : f32
    %69 = arith.mulf %62, %62 : f32
    %70 = arith.subf %68, %69 : f32
    %71 = vector.broadcast %62 : f32 to vector<8x169xf32>
    %72 = arith.subf %53, %71 : vector<8x169xf32>
    %cst_33 = arith.constant 9.99999974E-6 : f32
    %73 = arith.addf %70, %cst_33 : f32
    %74 = math.rsqrt %73 : f32
    %75 = vector.broadcast %74 : f32 to vector<8x169xf32>
    %76 = arith.mulf %72, %75 : vector<8x169xf32>
    %77 = arith.mulf %76, %55 : vector<8x169xf32>
    %78 = arith.addf %77, %57 : vector<8x169xf32>
    %cst_34 = arith.constant 5.000000e-01 : f32
    %79 = vector.broadcast %cst_34 : f32 to vector<8x169xf32>
    %80 = arith.mulf %79, %78 : vector<8x169xf32>
    %cst_35 = arith.constant 0.707106769 : f32
    %81 = vector.broadcast %cst_35 : f32 to vector<8x169xf32>
    %82 = arith.mulf %78, %81 : vector<8x169xf32>
    %83 = math.erf %82 : vector<8x169xf32>
    %cst_36 = arith.constant 1.000000e+00 : f32
    %84 = vector.broadcast %cst_36 : f32 to vector<8x169xf32>
    %85 = arith.addf %84, %83 : vector<8x169xf32>
    %86 = arith.mulf %80, %85 : vector<8x169xf32>
    %87 = vector.extract_strided_slice %2 {offsets = [0, 14], sizes = [4, 169], strides = [1, 1]} : vector<4x253xf32> to vector<4x169xf32>
    %88 = vector.extract_strided_slice %2 {offsets = [0, 16], sizes = [4, 169], strides = [1, 1]} : vector<4x253xf32> to vector<4x169xf32>
    %89 = vector.extract_strided_slice %2 {offsets = [0, 18], sizes = [4, 169], strides = [1, 1]} : vector<4x253xf32> to vector<4x169xf32>
    %90 = vector.extract_strided_slice %2 {offsets = [0, 40], sizes = [4, 169], strides = [1, 1]} : vector<4x253xf32> to vector<4x169xf32>
    %91 = vector.extract_strided_slice %2 {offsets = [0, 42], sizes = [4, 169], strides = [1, 1]} : vector<4x253xf32> to vector<4x169xf32>
    %92 = vector.extract_strided_slice %2 {offsets = [0, 44], sizes = [4, 169], strides = [1, 1]} : vector<4x253xf32> to vector<4x169xf32>
    %93 = vector.extract_strided_slice %2 {offsets = [0, 66], sizes = [4, 169], strides = [1, 1]} : vector<4x253xf32> to vector<4x169xf32>
    %94 = vector.extract_strided_slice %2 {offsets = [0, 68], sizes = [4, 169], strides = [1, 1]} : vector<4x253xf32> to vector<4x169xf32>
    %95 = vector.extract_strided_slice %2 {offsets = [0, 70], sizes = [4, 169], strides = [1, 1]} : vector<4x253xf32> to vector<4x169xf32>
    %96 = tpu.concatenate %87, %88, %89, %90, %91, %92, %93, %94, %95 in 0 : vector<4x169xf32>, vector<4x169xf32>, vector<4x169xf32>, vector<4x169xf32>, vector<4x169xf32>, vector<4x169xf32>, vector<4x169xf32>, vector<4x169xf32>, vector<4x169xf32> -> vector<36x169xf32>
    %c1_37 = arith.constant 1 : index
    %c0_38 = arith.constant 0 : index
    %c0_39 = arith.constant 0 : index
    %97 = vector.load %arg4[%c1_37, %c0_38, %c0_39] : memref<3x8x36xf32, #tpu.memory_space<vmem>>, vector<1x8x36xf32>
    %98 = vector.shape_cast %97 : vector<1x8x36xf32> to vector<8x36xf32>
    %cst_40 = arith.constant dense<0.000000e+00> : vector<8x169xf32>
    %99 = tpu.matmul %98, %96, %cst_40 {dimension_numbers = #tpu.dot_dimension_numbers<[1], [0], [0], [1], [0, 0, 1, 1], [], []>} : vector<8x36xf32>, vector<36x169xf32>, vector<8x169xf32> -> vector<8x169xf32>
    %100 = vector.broadcast %0 : vector<1x169xf32> to vector<8x169xf32>
    %101 = arith.mulf %99, %100 : vector<8x169xf32>
    %c2 = arith.constant 2 : index
    %c0_41 = arith.constant 0 : index
    %c0_42 = arith.constant 0 : index
    %102 = vector.load %arg7[%c2, %c0_41, %c0_42] : memref<5x8x169xf32, #tpu.memory_space<vmem>>, vector<1x8x169xf32>
    %103 = vector.shape_cast %102 : vector<1x8x169xf32> to vector<8x169xf32>
    %c2_43 = arith.constant 2 : index
    %c0_44 = arith.constant 0 : index
    %c0_45 = arith.constant 0 : index
    %104 = vector.load %arg8[%c2_43, %c0_44, %c0_45] : memref<5x8x169xf32, #tpu.memory_space<vmem>>, vector<1x8x169xf32>
    %105 = vector.shape_cast %104 : vector<1x8x169xf32> to vector<8x169xf32>
    %106 = vector.shape_cast %101 : vector<8x169xf32> to vector<1x8x169xf32>
    %cst_46 = arith.constant dense<0.000000e+00> : vector<1xf32>
    %107 = vector.multi_reduction <add>, %106, %cst_46 [1, 2] : vector<1x8x169xf32> to vector<1xf32>
    %108 = vector.shape_cast %107 : vector<1xf32> to vector<1x1x1xf32>
    %109 = vector.extract %108[0, 0, 0] : f32 from vector<1x1x1xf32>
    %cst_47 = arith.constant 0.00255102036 : f32
    %110 = arith.mulf %109, %cst_47 : f32
    %111 = arith.mulf %101, %101 : vector<8x169xf32>
    %112 = vector.shape_cast %111 : vector<8x169xf32> to vector<1x8x169xf32>
    %cst_48 = arith.constant dense<0.000000e+00> : vector<1xf32>
    %113 = vector.multi_reduction <add>, %112, %cst_48 [1, 2] : vector<1x8x169xf32> to vector<1xf32>
    %114 = vector.shape_cast %113 : vector<1xf32> to vector<1x1x1xf32>
    %115 = vector.extract %114[0, 0, 0] : f32 from vector<1x1x1xf32>
    %cst_49 = arith.constant 0.00255102036 : f32
    %116 = arith.mulf %115, %cst_49 : f32
    %117 = arith.mulf %110, %110 : f32
    %118 = arith.subf %116, %117 : f32
    %119 = vector.broadcast %110 : f32 to vector<8x169xf32>
    %120 = arith.subf %101, %119 : vector<8x169xf32>
    %cst_50 = arith.constant 9.99999974E-6 : f32
    %121 = arith.addf %118, %cst_50 : f32
    %122 = math.rsqrt %121 : f32
    %123 = vector.broadcast %122 : f32 to vector<8x169xf32>
    %124 = arith.mulf %120, %123 : vector<8x169xf32>
    %125 = arith.mulf %124, %103 : vector<8x169xf32>
    %126 = arith.addf %125, %105 : vector<8x169xf32>
    %cst_51 = arith.constant 5.000000e-01 : f32
    %127 = vector.broadcast %cst_51 : f32 to vector<8x169xf32>
    %128 = arith.mulf %127, %126 : vector<8x169xf32>
    %cst_52 = arith.constant 0.707106769 : f32
    %129 = vector.broadcast %cst_52 : f32 to vector<8x169xf32>
    %130 = arith.mulf %126, %129 : vector<8x169xf32>
    %131 = math.erf %130 : vector<8x169xf32>
    %cst_53 = arith.constant 1.000000e+00 : f32
    %132 = vector.broadcast %cst_53 : f32 to vector<8x169xf32>
    %133 = arith.addf %132, %131 : vector<8x169xf32>
    %134 = arith.mulf %128, %133 : vector<8x169xf32>
    %135 = vector.extract_strided_slice %2 {offsets = [0, 0], sizes = [4, 169], strides = [1, 1]} : vector<4x253xf32> to vector<4x169xf32>
    %136 = vector.extract_strided_slice %2 {offsets = [0, 3], sizes = [4, 169], strides = [1, 1]} : vector<4x253xf32> to vector<4x169xf32>
    %137 = vector.extract_strided_slice %2 {offsets = [0, 6], sizes = [4, 169], strides = [1, 1]} : vector<4x253xf32> to vector<4x169xf32>
    %138 = vector.extract_strided_slice %2 {offsets = [0, 39], sizes = [4, 169], strides = [1, 1]} : vector<4x253xf32> to vector<4x169xf32>
    %139 = vector.extract_strided_slice %2 {offsets = [0, 42], sizes = [4, 169], strides = [1, 1]} : vector<4x253xf32> to vector<4x169xf32>
    %140 = vector.extract_strided_slice %2 {offsets = [0, 45], sizes = [4, 169], strides = [1, 1]} : vector<4x253xf32> to vector<4x169xf32>
    %141 = vector.extract_strided_slice %2 {offsets = [0, 78], sizes = [4, 169], strides = [1, 1]} : vector<4x253xf32> to vector<4x169xf32>
    %142 = vector.extract_strided_slice %2 {offsets = [0, 81], sizes = [4, 169], strides = [1, 1]} : vector<4x253xf32> to vector<4x169xf32>
    %143 = vector.extract_strided_slice %2 {offsets = [0, 84], sizes = [4, 169], strides = [1, 1]} : vector<4x253xf32> to vector<4x169xf32>
    %144 = tpu.concatenate %135, %136, %137, %138, %139, %140, %141, %142, %143 in 0 : vector<4x169xf32>, vector<4x169xf32>, vector<4x169xf32>, vector<4x169xf32>, vector<4x169xf32>, vector<4x169xf32>, vector<4x169xf32>, vector<4x169xf32>, vector<4x169xf32> -> vector<36x169xf32>
    %c2_54 = arith.constant 2 : index
    %c0_55 = arith.constant 0 : index
    %c0_56 = arith.constant 0 : index
    %145 = vector.load %arg4[%c2_54, %c0_55, %c0_56] : memref<3x8x36xf32, #tpu.memory_space<vmem>>, vector<1x8x36xf32>
    %146 = vector.shape_cast %145 : vector<1x8x36xf32> to vector<8x36xf32>
    %cst_57 = arith.constant dense<0.000000e+00> : vector<8x169xf32>
    %147 = tpu.matmul %146, %144, %cst_57 {dimension_numbers = #tpu.dot_dimension_numbers<[1], [0], [0], [1], [0, 0, 1, 1], [], []>} : vector<8x36xf32>, vector<36x169xf32>, vector<8x169xf32> -> vector<8x169xf32>
    %148 = vector.broadcast %0 : vector<1x169xf32> to vector<8x169xf32>
    %149 = arith.mulf %147, %148 : vector<8x169xf32>
    %c3 = arith.constant 3 : index
    %c0_58 = arith.constant 0 : index
    %c0_59 = arith.constant 0 : index
    %150 = vector.load %arg7[%c3, %c0_58, %c0_59] : memref<5x8x169xf32, #tpu.memory_space<vmem>>, vector<1x8x169xf32>
    %151 = vector.shape_cast %150 : vector<1x8x169xf32> to vector<8x169xf32>
    %c3_60 = arith.constant 3 : index
    %c0_61 = arith.constant 0 : index
    %c0_62 = arith.constant 0 : index
    %152 = vector.load %arg8[%c3_60, %c0_61, %c0_62] : memref<5x8x169xf32, #tpu.memory_space<vmem>>, vector<1x8x169xf32>
    %153 = vector.shape_cast %152 : vector<1x8x169xf32> to vector<8x169xf32>
    %154 = vector.shape_cast %149 : vector<8x169xf32> to vector<1x8x169xf32>
    %cst_63 = arith.constant dense<0.000000e+00> : vector<1xf32>
    %155 = vector.multi_reduction <add>, %154, %cst_63 [1, 2] : vector<1x8x169xf32> to vector<1xf32>
    %156 = vector.shape_cast %155 : vector<1xf32> to vector<1x1x1xf32>
    %157 = vector.extract %156[0, 0, 0] : f32 from vector<1x1x1xf32>
    %cst_64 = arith.constant 0.00255102036 : f32
    %158 = arith.mulf %157, %cst_64 : f32
    %159 = arith.mulf %149, %149 : vector<8x169xf32>
    %160 = vector.shape_cast %159 : vector<8x169xf32> to vector<1x8x169xf32>
    %cst_65 = arith.constant dense<0.000000e+00> : vector<1xf32>
    %161 = vector.multi_reduction <add>, %160, %cst_65 [1, 2] : vector<1x8x169xf32> to vector<1xf32>
    %162 = vector.shape_cast %161 : vector<1xf32> to vector<1x1x1xf32>
    %163 = vector.extract %162[0, 0, 0] : f32 from vector<1x1x1xf32>
    %cst_66 = arith.constant 0.00255102036 : f32
    %164 = arith.mulf %163, %cst_66 : f32
    %165 = arith.mulf %158, %158 : f32
    %166 = arith.subf %164, %165 : f32
    %167 = vector.broadcast %158 : f32 to vector<8x169xf32>
    %168 = arith.subf %149, %167 : vector<8x169xf32>
    %cst_67 = arith.constant 9.99999974E-6 : f32
    %169 = arith.addf %166, %cst_67 : f32
    %170 = math.rsqrt %169 : f32
    %171 = vector.broadcast %170 : f32 to vector<8x169xf32>
    %172 = arith.mulf %168, %171 : vector<8x169xf32>
    %173 = arith.mulf %172, %151 : vector<8x169xf32>
    %174 = arith.addf %173, %153 : vector<8x169xf32>
    %cst_68 = arith.constant 5.000000e-01 : f32
    %175 = vector.broadcast %cst_68 : f32 to vector<8x169xf32>
    %176 = arith.mulf %175, %174 : vector<8x169xf32>
    %cst_69 = arith.constant 0.707106769 : f32
    %177 = vector.broadcast %cst_69 : f32 to vector<8x169xf32>
    %178 = arith.mulf %174, %177 : vector<8x169xf32>
    %179 = math.erf %178 : vector<8x169xf32>
    %cst_70 = arith.constant 1.000000e+00 : f32
    %180 = vector.broadcast %cst_70 : f32 to vector<8x169xf32>
    %181 = arith.addf %180, %179 : vector<8x169xf32>
    %182 = arith.mulf %176, %181 : vector<8x169xf32>
    %c0_71 = arith.constant 0 : index
    %c0_72 = arith.constant 0 : index
    %183 = vector.load %arg5[%c0_71, %c0_72] : memref<8x4xf32, #tpu.memory_space<vmem>>, vector<8x4xf32>
    %cst_73 = arith.constant dense<0.000000e+00> : vector<8x169xf32>
    %184 = tpu.matmul %183, %3, %cst_73 {dimension_numbers = #tpu.dot_dimension_numbers<[1], [0], [0], [1], [0, 0, 1, 1], [], []>} : vector<8x4xf32>, vector<4x169xf32>, vector<8x169xf32> -> vector<8x169xf32>
    %cst_74 = arith.constant dense<0.000000e+00> : vector<8xf32>
    %185 = vector.multi_reduction <add>, %184, %cst_74 [1] : vector<8x169xf32> to vector<8xf32>
    %186 = vector.shape_cast %185 : vector<8xf32> to vector<8x1xf32>
    %cst_75 = arith.constant 0.0204081628 : f32
    %187 = vector.broadcast %cst_75 : f32 to vector<8x1xf32>
    %188 = arith.mulf %186, %187 : vector<8x1xf32>
    %189 = vector.shape_cast %188 : vector<8x1xf32> to vector<1x8x1xf32>
    %cst_76 = arith.constant dense<0.000000e+00> : vector<1xf32>
    %190 = vector.multi_reduction <add>, %189, %cst_76 [1, 2] : vector<1x8x1xf32> to vector<1xf32>
    %191 = vector.shape_cast %190 : vector<1xf32> to vector<1x1x1xf32>
    %192 = vector.extract %191[0, 0, 0] : f32 from vector<1x1x1xf32>
    %cst_77 = arith.constant 1.250000e-01 : f32
    %193 = arith.mulf %192, %cst_77 : f32
    %194 = arith.mulf %188, %188 : vector<8x1xf32>
    %195 = vector.shape_cast %194 : vector<8x1xf32> to vector<1x8x1xf32>
    %cst_78 = arith.constant dense<0.000000e+00> : vector<1xf32>
    %196 = vector.multi_reduction <add>, %195, %cst_78 [1, 2] : vector<1x8x1xf32> to vector<1xf32>
    %197 = vector.shape_cast %196 : vector<1xf32> to vector<1x1x1xf32>
    %198 = vector.extract %197[0, 0, 0] : f32 from vector<1x1x1xf32>
    %cst_79 = arith.constant 1.250000e-01 : f32
    %199 = arith.mulf %198, %cst_79 : f32
    %200 = arith.mulf %193, %193 : f32
    %201 = arith.subf %199, %200 : f32
    %202 = vector.broadcast %193 : f32 to vector<8x1xf32>
    %203 = arith.subf %188, %202 : vector<8x1xf32>
    %cst_80 = arith.constant 9.99999974E-6 : f32
    %204 = arith.addf %201, %cst_80 : f32
    %205 = math.rsqrt %204 : f32
    %206 = vector.broadcast %205 : f32 to vector<8x1xf32>
    %207 = arith.mulf %203, %206 : vector<8x1xf32>
    %c0_81 = arith.constant 0 : index
    %c0_82 = arith.constant 0 : index
    %208 = vector.load %arg9[%c0_81, %c0_82] : memref<8x1xf32, #tpu.memory_space<vmem>>, vector<8x1xf32>
    %209 = arith.mulf %207, %208 : vector<8x1xf32>
    %c0_83 = arith.constant 0 : index
    %c0_84 = arith.constant 0 : index
    %210 = vector.load %arg10[%c0_83, %c0_84] : memref<8x1xf32, #tpu.memory_space<vmem>>, vector<8x1xf32>
    %211 = arith.addf %209, %210 : vector<8x1xf32>
    %cst_85 = arith.constant 5.000000e-01 : f32
    %212 = vector.broadcast %cst_85 : f32 to vector<8x1xf32>
    %213 = arith.mulf %212, %211 : vector<8x1xf32>
    %cst_86 = arith.constant 0.707106769 : f32
    %214 = vector.broadcast %cst_86 : f32 to vector<8x1xf32>
    %215 = arith.mulf %211, %214 : vector<8x1xf32>
    %216 = math.erf %215 : vector<8x1xf32>
    %cst_87 = arith.constant 1.000000e+00 : f32
    %217 = vector.broadcast %cst_87 : f32 to vector<8x1xf32>
    %218 = arith.addf %217, %216 : vector<8x1xf32>
    %219 = arith.mulf %213, %218 : vector<8x1xf32>
    %220 = vector.broadcast %219 : vector<8x1xf32> to vector<8x169xf32>
    %221 = vector.broadcast %0 : vector<1x169xf32> to vector<8x169xf32>
    %222 = arith.mulf %220, %221 : vector<8x169xf32>
    %223 = tpu.concatenate %38, %86, %134, %182, %222 in 0 : vector<8x169xf32>, vector<8x169xf32>, vector<8x169xf32>, vector<8x169xf32>, vector<8x169xf32> -> vector<40x169xf32>
    %c0_88 = arith.constant 0 : index
    %c0_89 = arith.constant 0 : index
    %224 = vector.load %arg6[%c0_88, %c0_89] : memref<8x40xf32, #tpu.memory_space<vmem>>, vector<8x40xf32>
    %cst_90 = arith.constant dense<0.000000e+00> : vector<8x169xf32>
    %225 = tpu.matmul %224, %223, %cst_90 {dimension_numbers = #tpu.dot_dimension_numbers<[1], [0], [0], [1], [0, 0, 1, 1], [], []>} : vector<8x40xf32>, vector<40x169xf32>, vector<8x169xf32> -> vector<8x169xf32>
    %c4 = arith.constant 4 : index
    %c0_91 = arith.constant 0 : index
    %c0_92 = arith.constant 0 : index
    %226 = vector.load %arg7[%c4, %c0_91, %c0_92] : memref<5x8x169xf32, #tpu.memory_space<vmem>>, vector<1x8x169xf32>
    %227 = vector.shape_cast %226 : vector<1x8x169xf32> to vector<8x169xf32>
    %c4_93 = arith.constant 4 : index
    %c0_94 = arith.constant 0 : index
    %c0_95 = arith.constant 0 : index
    %228 = vector.load %arg8[%c4_93, %c0_94, %c0_95] : memref<5x8x169xf32, #tpu.memory_space<vmem>>, vector<1x8x169xf32>
    %229 = vector.shape_cast %228 : vector<1x8x169xf32> to vector<8x169xf32>
    %230 = vector.shape_cast %225 : vector<8x169xf32> to vector<1x8x169xf32>
    %cst_96 = arith.constant dense<0.000000e+00> : vector<1xf32>
    %231 = vector.multi_reduction <add>, %230, %cst_96 [1, 2] : vector<1x8x169xf32> to vector<1xf32>
    %232 = vector.shape_cast %231 : vector<1xf32> to vector<1x1x1xf32>
    %233 = vector.extract %232[0, 0, 0] : f32 from vector<1x1x1xf32>
    %cst_97 = arith.constant 0.00255102036 : f32
    %234 = arith.mulf %233, %cst_97 : f32
    %235 = arith.mulf %225, %225 : vector<8x169xf32>
    %236 = vector.shape_cast %235 : vector<8x169xf32> to vector<1x8x169xf32>
    %cst_98 = arith.constant dense<0.000000e+00> : vector<1xf32>
    %237 = vector.multi_reduction <add>, %236, %cst_98 [1, 2] : vector<1x8x169xf32> to vector<1xf32>
    %238 = vector.shape_cast %237 : vector<1xf32> to vector<1x1x1xf32>
    %239 = vector.extract %238[0, 0, 0] : f32 from vector<1x1x1xf32>
    %cst_99 = arith.constant 0.00255102036 : f32
    %240 = arith.mulf %239, %cst_99 : f32
    %241 = arith.mulf %234, %234 : f32
    %242 = arith.subf %240, %241 : f32
    %243 = vector.broadcast %234 : f32 to vector<8x169xf32>
    %244 = arith.subf %225, %243 : vector<8x169xf32>
    %cst_100 = arith.constant 9.99999974E-6 : f32
    %245 = arith.addf %242, %cst_100 : f32
    %246 = math.rsqrt %245 : f32
    %247 = vector.broadcast %246 : f32 to vector<8x169xf32>
    %248 = arith.mulf %244, %247 : vector<8x169xf32>
    %249 = arith.mulf %248, %227 : vector<8x169xf32>
    %250 = arith.addf %249, %229 : vector<8x169xf32>
    %cst_101 = arith.constant 5.000000e-01 : f32
    %251 = vector.broadcast %cst_101 : f32 to vector<8x169xf32>
    %252 = arith.mulf %251, %250 : vector<8x169xf32>
    %cst_102 = arith.constant 0.707106769 : f32
    %253 = vector.broadcast %cst_102 : f32 to vector<8x169xf32>
    %254 = arith.mulf %250, %253 : vector<8x169xf32>
    %255 = math.erf %254 : vector<8x169xf32>
    %cst_103 = arith.constant 1.000000e+00 : f32
    %256 = vector.broadcast %cst_103 : f32 to vector<8x169xf32>
    %257 = arith.addf %256, %255 : vector<8x169xf32>
    %258 = arith.mulf %252, %257 : vector<8x169xf32>
    %c0_104 = arith.constant 0 : index
    %c0_105 = arith.constant 0 : index
    %c0_106 = arith.constant 0 : index
    %259 = vector.load %arg11[%c0_104, %c0_105, %c0_106] : memref<1x8x169xf32, #tpu.memory_space<vmem>>, vector<1x8x169xf32>
    %260 = vector.shape_cast %259 : vector<1x8x169xf32> to vector<8x169xf32>
    %261 = vector.shape_cast %258 : vector<8x169xf32> to vector<1x8x169xf32>
    tpu.vector_store %arg11[%c0_104, %c0_105, %c0_106], %261 {strides = array<i32>} : memref<1x8x169xf32, #tpu.memory_space<vmem>>, vector<1x8x169xf32>,
    return
  }
  func.func @transform_0(%arg0: i32) -> (i32, i32, i32) {
    %c0_i32 = arith.constant 0 : i32
    %c0_i32_0 = arith.constant 0 : i32
    %c0_i32_1 = arith.constant 0 : i32
    return %arg0, %c0_i32, %c0_i32_0 : i32, i32, i32
  }
  func.func @transform_1(%arg0: i32) -> (i32, i32) {
    %c0_i32 = arith.constant 0 : i32
    %c0_i32_0 = arith.constant 0 : i32
    %c0_i32_1 = arith.constant 0 : i32
    return %c0_i32, %c0_i32_0 : i32, i32
  }
  func.func @transform_2(%arg0: i32) -> (i32, i32) {
    %c0_i32 = arith.constant 0 : i32
    %c0_i32_0 = arith.constant 0 : i32
    %c0_i32_1 = arith.constant 0 : i32
    return %c0_i32, %c0_i32_0 : i32, i32
  }
  func.func @transform_3(%arg0: i32) -> (i32, i32, i32) {
    %c0_i32 = arith.constant 0 : i32
    %c0_i32_0 = arith.constant 0 : i32
    %c0_i32_1 = arith.constant 0 : i32
    %c0_i32_2 = arith.constant 0 : i32
    return %c0_i32, %c0_i32_0, %c0_i32_1 : i32, i32, i32
  }
  func.func @transform_4(%arg0: i32) -> (i32, i32) {
    %c0_i32 = arith.constant 0 : i32
    %c0_i32_0 = arith.constant 0 : i32
    %c0_i32_1 = arith.constant 0 : i32
    return %c0_i32, %c0_i32_0 : i32, i32
  }
  func.func @transform_5(%arg0: i32) -> (i32, i32) {
    %c0_i32 = arith.constant 0 : i32
    %c0_i32_0 = arith.constant 0 : i32
    %c0_i32_1 = arith.constant 0 : i32
    return %c0_i32, %c0_i32_0 : i32, i32
  }
  func.func @transform_6(%arg0: i32) -> (i32, i32, i32) {
    %c0_i32 = arith.constant 0 : i32
    %c0_i32_0 = arith.constant 0 : i32
    %c0_i32_1 = arith.constant 0 : i32
    %c0_i32_2 = arith.constant 0 : i32
    return %c0_i32, %c0_i32_0, %c0_i32_1 : i32, i32, i32
  }
  func.func @transform_7(%arg0: i32) -> (i32, i32, i32) {
    %c0_i32 = arith.constant 0 : i32
    %c0_i32_0 = arith.constant 0 : i32
    %c0_i32_1 = arith.constant 0 : i32
    %c0_i32_2 = arith.constant 0 : i32
    return %c0_i32, %c0_i32_0, %c0_i32_1 : i32, i32, i32
  }
  func.func @transform_8(%arg0: i32) -> (i32, i32) {
    %c0_i32 = arith.constant 0 : i32
    %c0_i32_0 = arith.constant 0 : i32
    %c0_i32_1 = arith.constant 0 : i32
    return %c0_i32, %c0_i32_0 : i32, i32
  }
  func.func @transform_9(%arg0: i32) -> (i32, i32) {
    %c0_i32 = arith.constant 0 : i32
    %c0_i32_0 = arith.constant 0 : i32
    %c0_i32_1 = arith.constant 0 : i32
    return %c0_i32, %c0_i32_0 : i32, i32
  }
  func.func @transform_10(%arg0: i32) -> (i32, i32, i32) {
    %c0_i32 = arith.constant 0 : i32
    %c0_i32_0 = arith.constant 0 : i32
    %c0_i32_1 = arith.constant 0 : i32
    return %arg0, %c0_i32, %c0_i32_0 : i32, i32, i32
  }
}

</mosaic_0001>

<bundles_post_ra>
// kernel: tpu_custom_call.1
= control target key start
LH: loop header
LB: loop body
LE: loop exit
PB: predicated region body
PF: predicated region fallthrough
CT: control target
= control target key end

     0   :  { %15 = vsyncpa [#allocation3], 0  ;;  %s2514_s0 = inlined_call_operand.vmem [shape: f32[2,4,253], index: 0, kind: input, shape index: {}]   ;;  %s2515_s1 = inlined_call_operand.hbm [shape: f32[1,169], index: 1, kind: input, shape index: {}]   ;;  %s2516_s2 = inlined_call_operand.vmem [shape: f32[8,4], index: 2, kind: input, shape index: {}]   ;;  %s2517_s3 = inlined_call_operand.vmem [shape: f32[3,8,36], index: 3, kind: input, shape index: {}]   ;;  %s2518_s4 = inlined_call_operand.vmem [shape: f32[8,4], index: 4, kind: input, shape index: {}]   ;;  %s2519_s5 = inlined_call_operand.vmem [shape: f32[8,40], index: 5, kind: input, shape index: {}]   ;;  %s2520_s6 = inlined_call_operand.hbm [shape: f32[5,8,169], index: 6, kind: input, shape index: {}]   ;;  %s2521_s7 = inlined_call_operand.hbm [shape: f32[5,8,169], index: 7, kind: input, shape index: {}]   ;;  %s2522_s8 = inlined_call_operand.vmem [shape: f32[8,1], index: 8, kind: input, shape index: {}]   ;;  %s2523_s9 = inlined_call_operand.vmem [shape: f32[8,1], index: 9, kind: input, shape index: {}]   ;;  %s2524_s10 = inlined_call_operand.hbm [shape: f32[2,8,169], index: 10, kind: output, shape index: {}]  }
   0x1   :  { %16 = vsyncpa [#allocation6], 0 }
   0x2   :  { %17 = vsyncpa [#allocation4], 0 }
   0x3   :  { %19 = vsyncpa [#allocation4 + $0x1], 0  ;;  %s2064_s13 = smov 0   ;;  %s2066_s14 = smov 0  }
   0x4   :  { %s2068_s15 = smov 0   ;;  %s2070_s16 = smov 0  }
   0x5 LB: > { %s2085_s17 = sadd.s32 4294967295, %s1978_s16   ;;  %s1626_s18 = sadd.s32 4294967294, %s1978_s16   ;;  %s1978_s16 = sphi %s2070_s16, %s2542_s16   ;;  %s1974_s15 = sphi %s2068_s15, %s2541_s15   ;;  %s1970_s14 = sphi %s2066_s14, %s2540_s14   ;;  %s1966_s13 = sphi %s2064_s13, %s2539_s13  }
   0x6   : > { %s2089_s19 = sadd.s32 1, %s1978_s16   ;;  %s247_s20 = sadd.s32 1, %s1974_s15 }
   0x7   : > { %s244_s21 = ssub.s32 %s1978_s16, %s2089_s19  ;;  %p257_p0 = scmp.ne.s32.totalorder %s1974_s15, %s1970_s14 }
   0x8   : > { %p245_p1 = scmp.eq.s32.totalorder %s244_s21, 0  ;;  %p258_p2 = scmp.eq.s32.totalorder %s2085_s17, 1 }
   0x9   : > { %p263_p3 = scmp.ne.s32.totalorder %s1970_s14, %s1966_s13  ;;  %p264_p4 = scmp.eq.s32.totalorder %s1626_s18, 1 }
   0xa   : > { %s2100_s22 = scalar_select %p245_p1, %s1974_s15, %s247_s20  }
   0xb   : > { %p2102_p5 = por %p258_p2, %p257_p0  ;;  %p2106_p6 = por %p264_p4, %p263_p3 }
   0xc   : > { %2527 = sst [smem:[#allocation12_spill]] %s2100_s22  ;;  %p1627_p7 = scmp.ge.s32.totalorder %s1978_s16, 1 }
   0xd   : > { %s2528_s23 = scalar_select %p2102_p5, 1, 0 }
   0xe   : > { %s2529_s24 = scalar_select %p2106_p6, 1, 0 }
   0xf   : > { %p271_p8 = scmp.lt.s32.totalorder %s1978_s16, 3  ;;  %p2525_p9 = scmp.eq.s32.totalorder %s2085_s17, 0 }
  0x10   : > { %s1980_s26 = smov [#allocation5]   ;;  %s1981_s29 = smov [#allocation2]  }
  0x11   : > { %p2113_p10 = pnand %p1627_p7, %p271_p8  ;;  %s306_s27 = sshll.u32 %s1980_s26, 4  ;;  %s307_s27 = int_to_ptr.vmem [resolvable:$true] %s306_s27 }
  0x12   : > { %s284_s30 = sshll.u32 %s1981_s29, 4  ;;  %s1982_s11 = smov [#allocation7]   ;;  %s285_s30 = int_to_ptr.vmem [resolvable:$true] %s284_s30 }
  0x13   : > { %p1714_p11 = pneg %p2113_p10  ;;  %s319_s12 = sshll.u32 %s1982_s11, 4  ;;  %s320_s12 = int_to_ptr.vmem [resolvable:$true] %s319_s12 }
  0x14   : > { %s1843_s18 = scalar_lea.vmem %s307_s27, 1280  ;;  %p1851_p3 = scmp.lt.s32.totalorder %s307_s27, %s307_s27 }
  0x15   : > { %p2121_p12 = pnand %p2525_p9, %p1714_p11  ;;  %p1844_p0 = scmp.ne.s32.totalorder %s307_s27, %s1843_s18 }
  0x16   : > { %p1852_p4 = scmp.lt.s32.totalorder %s1843_s18, %s1843_s18 }
  0x17   : > { %p1834_p13 = pneg %p2121_p12 }
  0x18   : > { %p1853_p7 = por %p1852_p4, %p1851_p3 }
  0x19   : > { %p1846_p1 = pnand %p1844_p0, %p1834_p13 }
  0x1b   : > { %p1847_p2 = pneg %p1846_p1 }
  0x1d   : > { %p1854_p8 = pnand %p1853_p7, %p1847_p2 }
  0x1f   : > { %1857 = shalt.err (!%p1854_p8)
}
  0x20   : > { %s1983_s20 = smov 256   ;;  %s1984_s21 = smov 16  }
  0x21   : > { %1720 = dma.hbm_to_vmem [thread:$0]  (!%p2121_p12), %s2520_s6, 1280, %s307_s27, [#allocation6], %s1983_s20, %s1983_s20, %s1984_s21  }
  0x22   : > { %s1869_s11 = scalar_lea.vmem %s285_s30, 32  ;;  %p1877_p9 = scmp.lt.s32.totalorder %s285_s30, %s285_s30 }
  0x23   : > { %p1870_p11 = scmp.ne.s32.totalorder %s285_s30, %s1869_s11  ;;  %p1878_p6 = scmp.lt.s32.totalorder %s1869_s11, %s1869_s11 }
  0x25   : > { %p1872_p0 = pnand %p1870_p11, %p1834_p13  ;;  %p1879_p3 = por %p1878_p6, %p1877_p9 }
  0x27   : > { %p1873_p1 = pneg %p1872_p0 }
  0x29   : > { %p1880_p2 = pnand %p1879_p3, %p1873_p1 }
  0x2b   : > { %1883 = shalt.err (!%p1880_p2)
}
  0x2c   : > { %1717 = dma.hbm_to_vmem [thread:$0]  (!%p2121_p12), %s2515_s1, 32, %s285_s30, [#allocation3]  }
  0x2d   : > { %s1895_s27 = scalar_lea.vmem %s320_s12, 1280  ;;  %p1903_p11 = scmp.lt.s32.totalorder %s320_s12, %s320_s12 }
  0x2e   : > { %p1896_p4 = scmp.ne.s32.totalorder %s320_s12, %s1895_s27  ;;  %p1904_p0 = scmp.lt.s32.totalorder %s1895_s27, %s1895_s27 }
  0x30   : > { %p1898_p7 = pnand %p1896_p4, %p1834_p13  ;;  %p1905_p5 = por %p1904_p0, %p1903_p11 }
  0x32   : > { %p1899_p8 = pneg %p1898_p7 }
  0x34   : > { %p1906_p6 = pnand %p1905_p5, %p1899_p8 }
  0x36   : > { %1909 = shalt.err (!%p1906_p6)
}
  0x37   : > { %1723 = dma.hbm_to_vmem [thread:$0]  (!%p2121_p12), %s2521_s7, 1280, %s320_s12, [#allocation6], %s1983_s20, %s1983_s20, %s1984_s21  }
  0x38   : > { %349 = sbr.rel (%p2113_p10) target bundleno = 1785 (0x6f9), region = 60  ;;  %p2532_p9 = scmp.eq.s32.totalorder (!%p2113_p10), %s2085_s17, 0 }
  0x3d   : > { %1953 = dma.done.wait (%p2532_p9), [#allocation3], 32   ;;  %p2533_p13 = pmov %p2532_p9 }
  0x3e   : > { %p2534_p1 = pmov %p2532_p9 }
  0x3f   : > { %1955 = vsyncadd (%p2533_p13), [#allocation3], 4294967264 }
  0x40   : > { %1957 = dma.done.wait (%p2534_p1), [#allocation6], 2560   ;;  %p2535_p5 = pmov %p2534_p1 }
  0x41   : > { %p395_p3 = scmp.lt.s32.totalorder %s2085_s17, 1  ;;  %s1985_s20 = smov 100   ;;  %v1993_v3 = vmov 0.0   ;;  %vm610_vm0 = vcmask 818176   ;;  %vm409_vm1 = vcmask 703488   ;;  %vm415_vm2 = vcmask 1043456  }
  0x42   : > { %1959 = vsyncadd (%p2535_p5), [#allocation6], 4294964736  ;;  %s1986_s21 = smov 86   ;;  %s1987_s11 = smov 102   ;;  %484 = vmatprep.mubr.f32.mxu1 %v1993_v3  ;;  %984 = vmatprep.mubr.f32.mxu0 %v1993_v3  ;;  %v402_v11 = vld [vmem:[%s2516_s2] sm:$0xff]  ;;  %vm411_vm3 = vcmask 31744  }
  0x43   : > { %s396_s22 = scalar_select %p395_p3, %s2085_s17, 1  ;;  %vm594_vm4 = vcmask 834560   ;;  %vm602_vm5 = vcmask 826368   ;;  %vm578_vm6 = vcmask 932864   ;;  %vm586_vm7 = vcmask 924672   ;;  %v620_v61 = vld [vmem:[%s2517_s3] sm:$0xff] }
  0x44   : > { %s1988_s18 = smov 101   ;;  %s1989_s27 = smov 114   ;;  %vm562_vm8 = vcmask 1031168   ;;  %vm570_vm9 = vcmask 941056   ;;  %vm554_vm10 = vcmask 1039360   ;;  %vm860_vm11 = vcmask 588800  }
  0x45   : > { %s1662_s28 = sshll.u32 %s396_s22, 3  ;;  %s1990_s26 = smov 113   ;;  %vm844_vm12 = vcmask 621568   ;;  %vm852_vm13 = vcmask 605184   ;;  %vm662_vm14 = vcmask 293888   ;;  %vm836_vm15 = vcmask 801792  }
  0x46   : > { %s399_s12 = scalar_lea.vmem %s2514_s0, %s1662_s28  ;;  %s1991_s29 = smov 126  }
  0x47   : > { %v2166_v0 = vld [vmem:[%s399_s12] sm:$0xff]  ;;  %s1992_s22 = smov 115   ;;  %s1994_s28 = smov 127  }
  0x48   : > { %606 = vrot.lane.b32.xlu1 %v2166_v0, %s1985_s20  ;;  %405 = vrot.lane.b32.xlu0 %v2166_v0, %s1986_s21  ;;  %v2173_v1 = vcombine.high %v2166_v0, %v2166_v0  ;;  %v2184_v2 = vcombine.low %v2166_v0, %v2166_v0  ;;  %s1995_s30 = smov 72   ;;  %s1996_s25 = smov 76  }
  0x49   : > { %s1997_s12 = smov 74   ;;  %p2536_p12 = scmp.ne.s32.totalorder %s2528_s23, 0 }
  0x4c   : > { %590 = vrot.lane.b32.xlu0 %v2166_v0, %s1987_s11  ;;  %608 = vrot.lane.b32.xlu1 %v2173_v1, %s1985_s20 }
  0x50   : > { %592 = vrot.lane.b32.xlu1 %v2173_v1, %s1987_s11  ;;  %407 = vrot.lane.b32.xlu0 %v2173_v1, %s1986_s21  ;;  %s2006_s21 = smov 125  }
  0x54   : > { %600 = vrot.lane.b32.xlu1 %v2166_v0, %s1988_s18  ;;  %598 = vrot.lane.b32.xlu0 %v2184_v2, %s1988_s18 }
  0x58   : > { %576 = vrot.lane.b32.xlu1 %v2173_v1, %s1989_s27  ;;  %574 = vrot.lane.b32.xlu0 %v2166_v0, %s1989_s27 }
  0x5c   : > { %584 = vrot.lane.b32.xlu1 %v2166_v0, %s1990_s26  ;;  %582 = vrot.lane.b32.xlu0 %v2184_v2, %s1990_s26  ;;  %s1998_s26 = smov 98  }
  0x60   : > { %560 = vrot.lane.b32.xlu1 %v2173_v1, %s1991_s29  ;;  %558 = vrot.lane.b32.xlu0 %v2166_v0, %s1991_s29 }
  0x64   : > { %568 = vrot.lane.b32.xlu1 %v2166_v0, %s1992_s22  ;;  %566 = vrot.lane.b32.xlu0 %v2184_v2, %s1992_s22  ;;  %s1999_s22 = smov 124  }
  0x68   : > { %552 = vrot.lane.b32.xlu1 %v2166_v0, %s1994_s28  ;;  %550 = vrot.lane.b32.xlu0 %v2184_v2, %s1994_s28  ;;  %s2001_s28 = smov 50  }
  0x6c   : > { %856 = vrot.lane.b32.xlu0 %v2166_v0, %s1995_s30  ;;  %858 = vrot.lane.b32.xlu1 %v2173_v1, %s1995_s30  ;;  %s2002_s30 = smov 47  }
  0x70   : > { %840 = vrot.lane.b32.xlu0 %v2166_v0, %s1996_s25  ;;  %842 = vrot.lane.b32.xlu1 %v2173_v1, %s1996_s25  ;;  %s2004_s25 = smov 122  }
  0x74   : > { %848 = vrot.lane.b32.xlu0 %v2184_v2, %s1997_s12 }
  0xba   : > { %v607_v4 = vpop.permute.xlu1 %606  ;;  %v406_v5 = vpop.permute.xlu0 %405 }
  0xbe   : > { %v2210_v6 = vpop.permute.xlu0 %590  ;;  %v2212_v7 = vpop.permute.xlu1 %608 }
  0xbf   : > { %v2216_v8 = vsel %vm610_vm0, %v607_v4, %v2212_v7 }
  0xc0   : > { %645 = vrot.lane.b32.xlu0 %v2216_v8, %s1985_s20 }
  0xc2   : > { %v593_v9 = vpop.permute.xlu1 %592  ;;  %v2220_v10 = vpop.permute.xlu0 %407 }
  0xc3   : > { %1639 = vmatprep.subr.msk.mxu1 %vm415_vm2, %v2220_v10  ;;  %v2228_v12 = vsel %vm409_vm1, %v406_v5, %v2220_v10  ;;  %v595_v15 = vsel %vm594_vm4, %v2210_v6, %v593_v9  ;;  %vm495_vm1 = vcmask 334848  }
  0xc4   : > { %1640 = vmatpush1.msk.msra.mxu1 %vm415_vm2, %v2228_v12 }
  0xc5   : > { %1641 = vmatmul.mubr.msk.f32.vlgmr.msra.gmra.mxu1 %vm411_vm3, %v402_v11 }
  0xc6   : > { %v601_v13 = vpop.permute.xlu1 %600  ;;  %v599_v14 = vpop.permute.xlu0 %598  ;;  %734 = vmatprep.mubr.f32.mxu1 %v1993_v3 }
  0xc7   : > { %v603_v16 = vsel %vm602_vm5, %v599_v14, %v601_v13  ;;  %v619_v37 = vsel %vm415_vm2, %v593_v9, %v601_v13  ;;  %vm1089_vm5 = vcmask 408576  }
  0xc8   : > { %v618_v17 = vsel %vm415_vm2, %v595_v15, %v603_v16 }
  0xc9   : > { %641 = vrot.lane.b32.xlu0 %v618_v17, %s1985_s20 }
  0xca   : > { %v577_v18 = vpop.permute.xlu1 %576  ;;  %v575_v19 = vpop.permute.xlu0 %574 }
  0xcb   : > { %v579_v22 = vsel %vm578_vm6, %v575_v19, %v577_v18 }
  0xce   : > { %v585_v20 = vpop.permute.xlu1 %584  ;;  %v583_v21 = vpop.permute.xlu0 %582 }
  0xcf   : > { %v587_v23 = vsel %vm586_vm7, %v583_v21, %v585_v20  ;;  %v617_v38 = vsel %vm415_vm2, %v577_v18, %v585_v20  ;;  %vm1081_vm7 = vcmask 678912  }
  0xd0   : > { %v616_v24 = vsel %vm415_vm2, %v579_v22, %v587_v23 }
  0xd1   : > { %637 = vrot.lane.b32.xlu0 %v616_v24, %s1985_s20 }
  0xd2   : > { %v561_v25 = vpop.permute.xlu1 %560  ;;  %v2241_v26 = vpop.permute.xlu0 %558 }
  0xd3   : > { %v563_v29 = vsel %vm562_vm8, %v2241_v26, %v561_v25  ;;  %v863_v24 = vsel %vm415_vm2, %v2173_v1, %v2241_v26 }
  0xd6   : > { %v569_v27 = vpop.permute.xlu1 %568  ;;  %v567_v28 = vpop.permute.xlu0 %566 }
  0xd7   : > { %v571_v30 = vsel %vm570_vm9, %v567_v28, %v569_v27  ;;  %v615_v42 = vsel %vm415_vm2, %v561_v25, %v569_v27  ;;  %vm1055_vm9 = vcmask 1022976  }
  0xd8   : > { %v614_v31 = vsel %vm415_vm2, %v563_v29, %v571_v30 }
  0xd9   : > { %633 = vrot.lane.b32.xlu0 %v614_v31, %s1985_s20 }
  0xda   : > { %v553_v32 = vpop.permute.xlu1 %552  ;;  %v551_v33 = vpop.permute.xlu0 %550 }
  0xdb   : > { %v555_v34 = vsel %vm554_vm10, %v551_v33, %v553_v32  ;;  %v613_v35 = vsel %vm415_vm2, %v2173_v1, %v553_v32  ;;  %vm1386_vm10 = vcmask 326656  }
  0xdc   : > { %631 = vrot.lane.b32.xlu1 %v613_v35, %s1985_s20  ;;  %v612_v36 = vsel %vm415_vm2, %v2166_v0, %v555_v34 }
  0xdd   : > { %629 = vrot.lane.b32.xlu0 %v612_v36, %s1985_s20 }
  0xde   : > { %v859_v39 = vpop.permute.xlu1 %858  ;;  %v857_v40 = vpop.permute.xlu0 %856 }
  0xdf   : > { %v861_v41 = vsel %vm860_vm11, %v857_v40, %v859_v39 }
  0xe0   : > { %647 = vrot.lane.b32.xlu1 %v2212_v7, %s1985_s20 }
  0xe1   : > { %832 = vrot.lane.b32.xlu0 %v2184_v2, %s1998_s26 }
  0xe2   : > { %v841_v43 = vpop.permute.xlu0 %840  ;;  %v843_v47 = vpop.permute.xlu1 %842 }
  0xe3   : > { %v845_v5 = vsel %vm844_vm12, %v841_v43, %v843_v47 }
  0xe4   : > { %643 = vrot.lane.b32.xlu1 %v619_v37, %s1985_s20 }
  0xe5   : > { %817 = vrot.lane.b32.xlu0 %v2166_v0, %s1999_s22 }
  0xe6   : > { %v849_v44 = vpop.permute.xlu0 %848 }
  0xe8   : > { %639 = vrot.lane.b32.xlu1 %v617_v38, %s1985_s20 }
  0xe9   : > { %825 = vrot.lane.b32.xlu0 %v2184_v2, %s1987_s11 }
  0xec   : > { %635 = vrot.lane.b32.xlu1 %v615_v42, %s1985_s20 }
  0xed   : > { %896 = vrot.lane.b32.xlu0 %v861_v41, %s1989_s27 }
  0xf0   : > { %850 = vrot.lane.b32.xlu1 %v2166_v0, %s1997_s12  ;;  %s2005_s12 = smov 89  }
  0xf4   : > { %834 = vrot.lane.b32.xlu1 %v2166_v0, %s1998_s26 }
  0xf8   : > { %819 = vrot.lane.b32.xlu1 %v2173_v1, %s1999_s22 }
  0xfc   : > { %812 = vrot.lane.b32.xlu1 %v2184_v2, %s1991_s29  ;;  %s2000_s29 = smov 44  }
 0x100   : > { %898 = vrot.lane.b32.xlu1 %v859_v39, %s1989_s27 }
 0x132   : > { %v646_v45 = vpop.permute.xlu0 %645 }
 0x13b   : > { %v642_v46 = vpop.permute.xlu0 %641 }
 0x143   : > { %v638_v48 = vpop.permute.xlu0 %637 }
 0x14b   : > { %v634_v50 = vpop.permute.xlu0 %633 }
 0x14e   : > { %v632_v49 = vpop.permute.xlu1 %631 }
 0x14f   : > { %v630_v53 = vpop.permute.xlu0 %629 }
 0x150   : > { %v649_v62 = vsel %vm610_vm0, %v630_v53, %v632_v49 }
 0x152   : > { %v648_v51 = vpop.permute.xlu1 %647 }
 0x153   : > { %v653_v52 = vsel %vm610_vm0, %v646_v45, %v648_v51  ;;  %1642 = vmatprep.subr.msk.mxu1 %vm415_vm2, %v648_v51  ;;  %v833_v58 = vpop.permute.xlu0 %832 }
 0x154   : > { %1643 = vmatpush1.msk.msra.mxu1 %vm415_vm2, %v653_v52 }
 0x156   : > { %v644_v54 = vpop.permute.xlu1 %643 }
 0x157   : > { %v652_v55 = vsel %vm610_vm0, %v642_v46, %v644_v54  ;;  %694 = vmatprep.subr.mxu1 %v644_v54  ;;  %v818_v63 = vpop.permute.xlu0 %817  ;;  %v1645_v46 = vld [vmem:[%s2517_s3 + $0x8] sm:$0xff] }
 0x158   : > { %695 = vmatpush1.msra.mxu1 %v652_v55 }
 0x15a   : > { %v640_v56 = vpop.permute.xlu1 %639 }
 0x15b   : > { %v651_v57 = vsel %vm610_vm0, %v638_v48, %v640_v56  ;;  %696 = vmatprep.subr.mxu1 %v640_v56  ;;  %v826_v17 = vpop.permute.xlu0 %825 }
 0x15c   : > { %697 = vmatpush1.msra.mxu1 %v651_v57  ;;  %v827_v20 = vsel %vm594_vm4, %v826_v17, %v2210_v6  ;;  %vm1105_vm4 = vcmask 359424  }
 0x15e   : > { %v636_v59 = vpop.permute.xlu1 %635 }
 0x15f   : > { %v650_v60 = vsel %vm610_vm0, %v634_v50, %v636_v59  ;;  %698 = vmatprep.subr.mxu1 %v636_v59  ;;  %vm821_vm0 = vcmask 1014784   ;;  %v1255_v50 = vld [vmem:[%s2518_s4] sm:$0xff] }
 0x160   : > { %699 = vmatpush1.msra.mxu1 %v650_v60 }
 0x161   : > { %700 = vmatprep.subr.mxu1 %v632_v49 }
 0x162   : > { %v851_v4 = vpop.permute.xlu1 %850  ;;  %701 = vmatpush1.msra.mxu1 %v649_v62 }
 0x163   : > { %v853_v9 = vsel %vm852_vm13, %v849_v44, %v851_v4  ;;  %1644 = vmatmul.mubr.msk.f32.vlgmr.msra.gmra.mxu1 %vm662_vm14, %v620_v61  ;;  %v869_v11 = vsel %vm415_vm2, %v843_v47, %v851_v4 }
 0x164   : > { %894 = vrot.lane.b32.xlu1 %v869_v11, %s1989_s27  ;;  %v868_v13 = vsel %vm415_vm2, %v845_v5, %v853_v9  ;;  %1188 = vmatprep.mubr.f32.mxu1 %v1993_v3 }
 0x165   : > { %892 = vrot.lane.b32.xlu0 %v868_v13, %s1989_s27 }
 0x166   : > { %v835_v14 = vpop.permute.xlu1 %834 }
 0x167   : > { %v837_v15 = vsel %vm836_vm15, %v833_v58, %v835_v14  ;;  %v867_v16 = vsel %vm415_vm2, %v2212_v7, %v835_v14 }
 0x168   : > { %890 = vrot.lane.b32.xlu1 %v867_v16, %s1989_s27  ;;  %v866_v18 = vsel %vm415_vm2, %v2216_v8, %v837_v15 }
 0x169   : > { %888 = vrot.lane.b32.xlu0 %v866_v18, %s1989_s27 }
 0x16a   : > { %v820_v19 = vpop.permute.xlu1 %819 }
 0x16b   : > { %v822_v21 = vsel %vm821_vm0, %v818_v63, %v820_v19  ;;  %v865_v22 = vsel %vm415_vm2, %v820_v19, %v2210_v6  ;;  %v897_v6 = vpop.permute.xlu0 %896  ;;  %v1649_v19 = vld [vmem:[%s2517_s3 + $0x10] sm:$0xff] }
 0x16c   : > { %886 = vrot.lane.b32.xlu1 %v865_v22, %s1989_s27  ;;  %v864_v7 = vsel %vm415_vm2, %v822_v21, %v827_v20  ;;  %v742_v21 = vlaneseq }
 0x16d   : > { %884 = vrot.lane.b32.xlu0 %v864_v7, %s1989_s27 }
 0x16e   : > { %v813_v23 = vpop.permute.xlu1 %812  ;;  %v743_v22 = vshrl.u32 %v742_v21, 7 }
 0x16f   : > { %v814_v8 = vsel %vm562_vm8, %v813_v23, %v2241_v26  ;;  %vm1071_vm8 = vcmask 728064   ;;  %v400_v23 = vld [vmem:[#allocation2] sm:$0x3] }
 0x170   : > { %882 = vrot.lane.b32.xlu1 %v863_v24, %s1989_s27  ;;  %v862_v25 = vsel %vm415_vm2, %v2166_v0, %v814_v8  ;;  %v744_v7 = vsub.s32 0, %v743_v22  ;;  %v748_v8 = vsub.s32 1, %v743_v22 }
 0x171   : > { %880 = vrot.lane.b32.xlu0 %v862_v25, %s1989_s27  ;;  %s2003_s27 = smov 83  }
 0x172   : > { %v899_v27 = vpop.permute.xlu1 %898  ;;  %v2376_v24 = vrot.slane %v400_v23, %v744_v7 }
 0x173   : > { %1646 = vmatprep.subr.msk.mxu0 %vm415_vm2, %v899_v27  ;;  %v904_v28 = vsel %vm578_vm6, %v897_v6, %v899_v27 }
 0x174   : > { %1103 = vrot.lane.b32.xlu1 %v2173_v1, %s2000_s29  ;;  %1647 = vmatpush1.msk.msra.mxu0 %vm415_vm2, %v904_v28 }
 0x175   : > { %1101 = vrot.lane.b32.xlu0 %v2166_v0, %s2000_s29 }
 0x178   : > { %1087 = vrot.lane.b32.xlu1 %v2173_v1, %s2001_s28 }
 0x179   : > { %1085 = vrot.lane.b32.xlu0 %v2166_v0, %s2001_s28 }
 0x17c   : > { %1095 = vrot.lane.b32.xlu1 %v2166_v0, %s2002_s30 }
 0x17d   : > { %1093 = vrot.lane.b32.xlu0 %v2184_v2, %s2002_s30 }
 0x180   : > { %1079 = vrot.lane.b32.xlu1 %v2166_v0, %s2003_s27 }
 0x181   : > { %1077 = vrot.lane.b32.xlu0 %v2184_v2, %s2003_s27 }
 0x184   : > { %1061 = vrot.lane.b32.xlu1 %v2173_v1, %s2004_s25 }
 0x185   : > { %1059 = vrot.lane.b32.xlu0 %v2166_v0, %s2004_s25  ;;  %v2328_v26 = vpop.f32.mrf.mxu1 }
 0x186   : > { %v508_v33 = vmul.f32 %v2328_v26, %v2328_v26 }
 0x187   : > { %v2330_v29 = vpop.f32.mrf.mxu1 }
 0x188   : > { %1069 = vrot.lane.b32.xlu1 %v2166_v0, %s2005_s12  ;;  %v509_v30 = vmul.f32 %v2330_v29, %v2330_v29  ;;  %v496_v31 = vsel %vm495_vm1, %v2330_v29, 0.0 }
 0x189   : > { %1067 = vrot.lane.b32.xlu0 %v2184_v2, %s2005_s12  ;;  %v497_v32 = vadd.f32 %v496_v31, %v2328_v26 }
 0x18a   : > { %v510_v34 = vsel %vm495_vm1, %v509_v30, 0.0 }
 0x18c   : > { %1053 = vrot.lane.b32.xlu1 %v2166_v0, %s2006_s21 }
 0x18d   : > { %1051 = vrot.lane.b32.xlu0 %v2184_v2, %s2006_s21  ;;  %v511_v2 = vadd.f32 %v510_v34, %v508_v33 }
 0x1ac   : > { %498 = vadd.xlane.f32.xlu0 %v497_v32 }
 0x1b0   : > { %512 = vadd.xlane.f32.xlu1 %v511_v2 }
 0x1d6   : > { %v895_v35 = vpop.permute.xlu1 %894 }
 0x1d7   : > { %944 = vmatprep.subr.mxu0 %v895_v35  ;;  %v893_v36 = vpop.permute.xlu0 %892 }
 0x1d8   : > { %v903_v37 = vsel %vm578_vm6, %v893_v36, %v895_v35 }
 0x1d9   : > { %945 = vmatpush1.msra.mxu0 %v903_v37 }
 0x1da   : > { %v891_v38 = vpop.permute.xlu1 %890 }
 0x1db   : > { %946 = vmatprep.subr.mxu0 %v891_v38  ;;  %v889_v39 = vpop.permute.xlu0 %888 }
 0x1dc   : > { %v902_v40 = vsel %vm578_vm6, %v889_v39, %v891_v38 }
 0x1dd   : > { %947 = vmatpush1.msra.mxu0 %v902_v40 }
 0x1de   : > { %v887_v41 = vpop.permute.xlu1 %886 }
 0x1df   : > { %948 = vmatprep.subr.mxu0 %v887_v41  ;;  %v885_v42 = vpop.permute.xlu0 %884 }
 0x1e0   : > { %v901_v43 = vsel %vm578_vm6, %v885_v42, %v887_v41 }
 0x1e1   : > { %949 = vmatpush1.msra.mxu0 %v901_v43 }
 0x1e2   : > { %v883_v44 = vpop.permute.xlu1 %882 }
 0x1e3   : > { %950 = vmatprep.subr.mxu0 %v883_v44  ;;  %v881_v45 = vpop.permute.xlu0 %880 }
 0x1e4   : > { %v900_v47 = vsel %vm578_vm6, %v881_v45, %v883_v44  ;;  %vm1097_vm6 = vcmask 384000  }
 0x1e5   : > { %951 = vmatpush1.msra.mxu0 %v900_v47 }
 0x1e6   : > { %v1104_v48 = vpop.permute.xlu1 %1103  ;;  %1648 = vmatmul.mubr.msk.f32.vlgmr.msra.gmra.mxu0 %vm662_vm14, %v1645_v46  ;;  %1653 = vmatprep.subr.msk.mxu0 %vm415_vm2, %v2220_v10 }
 0x1e7   : > { %1654 = vmatpush1.msk.msra.mxu0 %vm415_vm2, %v2228_v12  ;;  %v1102_v49 = vpop.permute.xlu0 %1101  ;;  %1323 = vmatprep.mubr.f32.mxu0 %v1993_v3 }
 0x1e8   : > { %v1106_v51 = vsel %vm1105_vm4, %v1102_v49, %v1104_v48  ;;  %1650 = vmatprep.subr.msk.mxu1 %vm415_vm2, %v1104_v48 }
 0x1e9   : > { %1651 = vmatpush1.msk.msra.mxu1 %vm415_vm2, %v1106_v51 }
 0x1ea   : > { %v1088_v52 = vpop.permute.xlu1 %1087  ;;  %1655 = vmatmul.mubr.msk.f32.vlgmr.msra.gmra.mxu0 %vm411_vm3, %v1255_v50  ;;  %vm1063_vm3 = vcmask 998400  }
 0x1eb   : > { %v1086_v53 = vpop.permute.xlu0 %1085  ;;  %1454 = vmatprep.mubr.f32.mxu0 %v1993_v3 }
 0x1ec   : > { %v1090_v54 = vsel %vm1089_vm5, %v1086_v53, %v1088_v52 }
 0x1ee   : > { %v1096_v55 = vpop.permute.xlu1 %1095 }
 0x1ef   : > { %v1094_v56 = vpop.permute.xlu0 %1093  ;;  %v1114_v57 = vsel %vm415_vm2, %v1088_v52, %v1096_v55 }
 0x1f0   : > { %v1098_v58 = vsel %vm1097_vm6, %v1094_v56, %v1096_v55  ;;  %1148 = vmatprep.subr.mxu1 %v1114_v57 }
 0x1f1   : > { %v1113_v59 = vsel %vm415_vm2, %v1090_v54, %v1098_v58 }
 0x1f2   : > { %v1080_v60 = vpop.permute.xlu1 %1079  ;;  %1149 = vmatpush1.msra.mxu1 %v1113_v59 }
 0x1f3   : > { %v1078_v61 = vpop.permute.xlu0 %1077  ;;  %v1112_v62 = vsel %vm415_vm2, %v2220_v10, %v1080_v60 }
 0x1f4   : > { %v1082_v63 = vsel %vm1081_vm7, %v1078_v61, %v1080_v60  ;;  %1150 = vmatprep.subr.mxu1 %v1112_v62 }
 0x1f5   : > { %v1111_v3 = vsel %vm415_vm2, %v2228_v12, %v1082_v63 }
 0x1f6   : > { %1151 = vmatpush1.msra.mxu1 %v1111_v3  ;;  %v1062_v4 = vpop.permute.xlu1 %1061 }
 0x1f7   : > { %v1060_v5 = vpop.permute.xlu0 %1059 }
 0x1f8   : > { %v1064_v9 = vsel %vm1063_vm3, %v1060_v5, %v1062_v4 }
 0x1fa   : > { %v1070_v11 = vpop.permute.xlu1 %1069 }
 0x1fb   : > { %v1068_v13 = vpop.permute.xlu0 %1067  ;;  %v1110_v14 = vsel %vm415_vm2, %v1062_v4, %v1070_v11 }
 0x1fc   : > { %v1072_v15 = vsel %vm1071_vm8, %v1068_v13, %v1070_v11  ;;  %1152 = vmatprep.subr.mxu1 %v1110_v14 }
 0x1fd   : > { %v1109_v10 = vsel %vm415_vm2, %v1064_v9, %v1072_v15 }
 0x1fe   : > { %v1054_v16 = vpop.permute.xlu1 %1053  ;;  %1153 = vmatpush1.msra.mxu1 %v1109_v10 }
 0x1ff   : > { %v1052_v17 = vpop.permute.xlu0 %1051  ;;  %v1108_v12 = vsel %vm415_vm2, %v2173_v1, %v1054_v16  ;;  %v2378_v1 = vrot.slane %v400_v23, %v748_v8 }
 0x200   : > { %v1056_v18 = vsel %vm1055_vm9, %v1052_v17, %v1054_v16  ;;  %1154 = vmatprep.subr.mxu1 %v1108_v12 }
 0x201   : > { %v1107_v20 = vsel %vm415_vm2, %v2166_v0, %v1056_v18  ;;  %vm1335_vm2 = vcmask 7168  }
 0x202   : > { %1155 = vmatpush1.msra.mxu1 %v1107_v20 }
 0x203   : > { %1652 = vmatmul.mubr.msk.f32.vlgmr.msra.gmra.mxu1 %vm662_vm14, %v1649_v19 }
 0x223   : > { %v736_v25 = vpop.f32.mrf.mxu1 }
 0x224   : > { %v2381_v6 = vmul.f32 %v2376_v24, %v736_v25 }
 0x225   : > { %v738_v27 = vpop.f32.mrf.mxu1 }
 0x226   : > { %v2384_v28 = vmul.f32 %v2378_v1, %v738_v27  ;;  %v772_v0 = vmul.f32 %v2381_v6, %v2381_v6 }
 0x228   : > { %v760_v30 = vsel %vm495_vm1, %v2384_v28, 0.0  ;;  %v773_v31 = vmul.f32 %v2384_v28, %v2384_v28 }
 0x229   : > { %v761_v32 = vadd.f32 %v760_v30, %v2381_v6 }
 0x22a   : > { %v774_v33 = vsel %vm495_vm1, %v773_v31, 0.0 }
 0x22b   : > { %762 = vadd.xlane.f32.xlu0 %v761_v32  ;;  %v775_v34 = vadd.f32 %v774_v33, %v772_v0 }
 0x22f   : > { %776 = vadd.xlane.f32.xlu0 %v775_v34 }
 0x235   : > { %v499_v2 = vpop.xlane.xlu0 %498 }
 0x236   : > { %v500_v35 = vrot.slane %v499_v2, 4 }
 0x238   : > { %v501_v36 = vadd.f32 %v500_v35, %v499_v2 }
 0x239   : > { %v513_v37 = vpop.xlane.xlu1 %512 }
 0x23a   : > { %v502_v38 = vrot.slane %v501_v36, 2  ;;  %v514_v39 = vrot.slane %v513_v37, 4 }
 0x23c   : > { %v515_v40 = vadd.f32 %v514_v39, %v513_v37  ;;  %v503_v41 = vadd.f32 %v502_v38, %v501_v36 }
 0x23e   : > { %v516_v42 = vrot.slane %v515_v40, 2  ;;  %v504_v43 = vrot.slane %v503_v41, 1 }
 0x240   : > { %v505_v44 = vadd.f32 %v504_v43, %v503_v41  ;;  %v517_v45 = vadd.f32 %v516_v42, %v515_v40 }
 0x242   : > { %1664 = vpush %v505_v44  ;;  %v518_v46 = vrot.slane %v517_v45, 1 }
 0x244   : > { %v519_v47 = vadd.f32 %v518_v46, %v517_v45 }
 0x246   : > { %1666 = vpush %v519_v47 }
 0x273   : > { %s1665_s28 = spop %1664 }
 0x274   : > { %s2394_s30 = smul.f32 0.0025510204, %s1665_s28 }
 0x276   : > { %s522_s27 = smul.f32 %s2394_s30, %s2394_s30  ;;  %v524_v14 = vstv %s2394_s30 }
 0x277   : > { %s1667_s25 = spop %1666  ;;  %v525_v12 = vsub.f32 %v2328_v26, %v524_v14  ;;  %v526_v18 = vsub.f32 %v2330_v29, %v524_v14 }
 0x278   : > { %s521_s12 = smul.f32 0.0025510204, %s1667_s25 }
 0x27a   : > { %s523_s21 = ssub.f32 %s521_s12, %s522_s27 }
 0x27c   : > { %s527_s18 = sadd.f32 1e-05, %s523_s21 }
 0x27e   : > { %v528_v48 = vstv %s527_s18 }
 0x27f   : > { %1798 = vrsqrt.f32 %v528_v48 }
 0x28c   : > { %v1799_v49 = vpop.eup %1798 }
 0x28d   : > { %1668 = vpush %v1799_v49 }
 0x2a6   : > { %v986_v50 = vpop.f32.mrf.mxu0 }
 0x2a7   : > { %v2399_v51 = vmul.f32 %v986_v50, %v2376_v24 }
 0x2a8   : > { %v988_v52 = vpop.f32.mrf.mxu0 }
 0x2a9   : > { %v2402_v53 = vmul.f32 %v988_v52, %v2378_v1  ;;  %v1011_v59 = vmul.f32 %v2399_v51, %v2399_v51 }
 0x2aa   : > { %v1325_v54 = vpop.f32.mrf.mxu0 }
 0x2ab   : > { %v999_v55 = vsel %vm495_vm1, %v2402_v53, 0.0  ;;  %v1012_v56 = vmul.f32 %v2402_v53, %v2402_v53 }
 0x2ac   : > { %v1327_v57 = vpop.f32.mrf.mxu0  ;;  %v1000_v58 = vadd.f32 %v999_v55, %v2399_v51 }
 0x2ad   : > { %v1013_v60 = vsel %vm495_vm1, %v1012_v56, 0.0  ;;  %v1330_v62 = vsel %vm495_vm1, %v1327_v57, 0.0 }
 0x2ae   : > { %1001 = vadd.xlane.f32.xlu1 %v1000_v58  ;;  %v1014_v61 = vadd.f32 %v1013_v60, %v1011_v59  ;;  %v1331_v63 = vadd.f32 %v1330_v62, %v1325_v54 }
 0x2b0   : > { %1015 = vadd.xlane.f32.xlu0 %v1014_v61 }
 0x2b4   : > { %1332 = vadd.xlane.f32.xlu0 %v1331_v63  ;;  %v763_v3 = vpop.xlane.xlu0 %762 }
 0x2b5   : > { %v764_v4 = vrot.slane %v763_v3, 4 }
 0x2b7   : > { %v765_v5 = vadd.f32 %v764_v4, %v763_v3 }
 0x2b8   : > { %v777_v9 = vpop.xlane.xlu0 %776 }
 0x2b9   : > { %v766_v11 = vrot.slane %v765_v5, 2  ;;  %v778_v13 = vrot.slane %v777_v9, 4 }
 0x2bb   : > { %v779_v15 = vadd.f32 %v778_v13, %v777_v9  ;;  %v767_v10 = vadd.f32 %v766_v11, %v765_v5 }
 0x2bd   : > { %v780_v16 = vrot.slane %v779_v15, 2  ;;  %v768_v17 = vrot.slane %v767_v10, 1 }
 0x2be   : > { %s1669_s26 = spop %1668 }
 0x2bf   : > { %v531_v19 = vstv %s1669_s26  ;;  %v769_v20 = vadd.f32 %v768_v17, %v767_v10  ;;  %v781_v21 = vadd.f32 %v780_v16, %v779_v15 }
 0x2c0   : > { %v2416_v22 = vmul.f32 %v531_v19, %v525_v12  ;;  %v2418_v7 = vmul.f32 %v531_v19, %v526_v18 }
 0x2c1   : > { %1670 = vpush %v769_v20  ;;  %v782_v23 = vrot.slane %v781_v21, 1 }
 0x2c3   : > { %v783_v8 = vadd.f32 %v782_v23, %v781_v21  ;;  %v1190_v25 = vpop.f32.mrf.mxu1 }
 0x2c4   : > { %v2421_v27 = vmul.f32 %v1190_v25, %v2376_v24 }
 0x2c5   : > { %1672 = vpush %v783_v8  ;;  %v1192_v0 = vpop.f32.mrf.mxu1 }
 0x2c6   : > { %v2424_v26 = vmul.f32 %v1192_v0, %v2378_v1  ;;  %v1215_v29 = vmul.f32 %v2421_v27, %v2421_v27 }
 0x2c8   : > { %v1203_v30 = vsel %vm495_vm1, %v2424_v26, 0.0  ;;  %v1216_v31 = vmul.f32 %v2424_v26, %v2424_v26 }
 0x2c9   : > { %v1204_v32 = vadd.f32 %v1203_v30, %v2421_v27 }
 0x2ca   : > { %v1217_v33 = vsel %vm495_vm1, %v1216_v31, 0.0 }
 0x2cb   : > { %1205 = vadd.xlane.f32.xlu1 %v1204_v32  ;;  %v1218_v34 = vadd.f32 %v1217_v33, %v1215_v29 }
 0x2cf   : > { %1219 = vadd.xlane.f32.xlu1 %v1218_v34 }
 0x2f2   : > { %s1671_s22 = spop %1670 }
 0x2f3   : > { %s771_s20 = smul.f32 0.0025510204, %s1671_s22 }
 0x2f5   : > { %s786_s11 = smul.f32 %s771_s20, %s771_s20  ;;  %v788_v39 = vstv %s771_s20 }
 0x2f6   : > { %s1673_s29 = spop %1672  ;;  %v789_v44 = vsub.f32 %v2381_v6, %v788_v39  ;;  %v790_v45 = vsub.f32 %v2384_v28, %v788_v39 }
 0x2f7   : > { %s785_s28 = smul.f32 0.0025510204, %s1673_s29 }
 0x2f9   : > { %s787_s30 = ssub.f32 %s785_s28, %s786_s11 }
 0x2fb   : > { %s791_s27 = sadd.f32 1e-05, %s787_s30 }
 0x2fd   : > { %v792_v2 = vstv %s791_s27 }
 0x2fe   : > { %1800 = vrsqrt.f32 %v792_v2 }
 0x30b   : > { %v1801_v35 = vpop.eup %1800 }
 0x30c   : > { %1674 = vpush %v1801_v35 }
 0x337   : > { %v1002_v36 = vpop.xlane.xlu1 %1001 }
 0x338   : > { %v1003_v37 = vrot.slane %v1002_v36, 4 }
 0x339   : > { %v1016_v38 = vpop.xlane.xlu0 %1015 }
 0x33a   : > { %v1004_v40 = vadd.f32 %v1003_v37, %v1002_v36  ;;  %v1017_v41 = vrot.slane %v1016_v38, 4 }
 0x33c   : > { %v1005_v42 = vrot.slane %v1004_v40, 2  ;;  %v1018_v43 = vadd.f32 %v1017_v41, %v1016_v38  ;;  %v2007_v41 = vmov 0  }
 0x33d   : > { %s1675_s25 = spop %1674  ;;  %v1333_v46 = vpop.xlane.xlu0 %1332  ;;  %1795 = vset.pattern.permute.xlu0 %v2007_v41 }
 0x33e   : > { %v1019_v47 = vrot.slane %v1018_v43, 2  ;;  %v795_v48 = vstv %s1675_s25  ;;  %v2436_v49 = vmul.f32 0.020408163, %v1333_v46  ;;  %v1006_v50 = vadd.f32 %v1005_v42, %v1004_v40 }
 0x33f   : > { %v2438_v52 = vmul.f32 %v795_v48, %v789_v44  ;;  %v2440_v54 = vmul.f32 %v795_v48, %v790_v45 }
 0x340   : > { %v1336_v55 = vsel %vm1335_vm2, %v2436_v49, 0.0  ;;  %v1347_v56 = vmul.f32 %v2436_v49, %v2436_v49  ;;  %v1007_v6 = vrot.slane %v1006_v50, 1  ;;  %v1020_v57 = vadd.f32 %v1019_v47, %v1018_v43 }
 0x341   : > { %1337 = vadd.xlane.f32.xlu0 %v1336_v55 }
 0x342   : > { %v1348_v28 = vsel %vm1335_vm2, %v1347_v56, 0.0  ;;  %v1008_v58 = vadd.f32 %v1007_v6, %v1006_v50  ;;  %v1021_v59 = vrot.slane %v1020_v57, 1  ;;  %v1369_v56 = vld [vmem:[%s2522_s8] sm:$0xff] }
 0x343   : > { %1349 = vadd.xlane.f32.xlu1 %v1348_v28 }
 0x344   : > { %1676 = vpush %v1008_v58  ;;  %v1022_v60 = vadd.f32 %v1021_v59, %v1020_v57  ;;  %v1371_v57 = vld [vmem:[%s2523_s9] sm:$0xff] }
 0x346   : > { %1678 = vpush %v1022_v60 }
 0x354   : > { %v1206_v61 = vpop.xlane.xlu1 %1205 }
 0x355   : > { %v1207_v63 = vrot.slane %v1206_v61, 4 }
 0x357   : > { %v1208_v4 = vadd.f32 %v1207_v63, %v1206_v61 }
 0x358   : > { %v1220_v62 = vpop.xlane.xlu1 %1219 }
 0x359   : > { %v1221_v3 = vrot.slane %v1220_v62, 4  ;;  %v1209_v11 = vrot.slane %v1208_v4, 2 }
 0x35b   : > { %v1222_v5 = vadd.f32 %v1221_v3, %v1220_v62  ;;  %v1210_v14 = vadd.f32 %v1209_v11, %v1208_v4  ;;  %v1198_v3 = vld [vmem:[#allocation5 + $0x30] sm:$0xff]  ;;  %v995_v4 = vld [vmem:[#allocation5 + $0x28] sm:$0xff]  ;;  %v756_v11 = vld [vmem:[#allocation5 + $0x18] sm:$0xff] }
 0x35d   : > { %v1223_v13 = vrot.slane %v1222_v5, 2  ;;  %v1211_v10 = vrot.slane %v1210_v14, 1 }
 0x35f   : > { %v1224_v15 = vadd.f32 %v1223_v13, %v1222_v5  ;;  %v1212_v12 = vadd.f32 %v1211_v10, %v1210_v14  ;;  %v994_v5 = vld [vmem:[#allocation5 + $0x20] sm:$0xff]  ;;  %v1202_v13 = vld [vmem:[#allocation7 + $0x38] sm:$0xff] }
 0x361   : > { %v1225_v16 = vrot.slane %v1224_v15, 1 }
 0x363   : > { %v1226_v18 = vadd.f32 %v1225_v16, %v1224_v15  ;;  %v755_v15 = vld [vmem:[#allocation5 + $0x10] sm:$0xff]  ;;  %v1201_v16 = vld [vmem:[#allocation7 + $0x30] sm:$0xff] }
 0x375   : > { %s1677_s12 = spop %1676 }
 0x376   : > { %s1010_s21 = smul.f32 0.0025510204, %s1677_s12 }
 0x377   : > { %s1679_s18 = spop %1678 }
 0x378   : > { %s1025_s26 = smul.f32 %s1010_s21, %s1010_s21  ;;  %v1027_v19 = vstv %s1010_s21 }
 0x379   : > { %s1024_s22 = smul.f32 0.0025510204, %s1679_s18  ;;  %v1028_v20 = vsub.f32 %v2399_v51, %v1027_v19  ;;  %v1029_v21 = vsub.f32 %v2402_v53, %v1027_v19  ;;  %v491_v19 = vld [vmem:[#allocation5] sm:$0xff] }
 0x37b   : > { %s1026_s20 = ssub.f32 %s1024_s22, %s1025_s26 }
 0x37d   : > { %s1030_s11 = sadd.f32 1e-05, %s1026_s20 }
 0x37f   : > { %v1031_v9 = vstv %s1030_s11 }
 0x380   : > { %1802 = vrsqrt.f32 %v1031_v9 }
 0x38d   : > { %v1803_v17 = vpop.eup %1802 }
 0x38e   : > { %1680 = vpush %v1803_v17  ;;  %v492_v17 = vld [vmem:[#allocation5 + $0x8] sm:$0xff] }
 0x38f   : > { %1682 = vpush %v1212_v12  ;;  %v998_v12 = vld [vmem:[#allocation7 + $0x28] sm:$0xff] }
 0x390   : > { %1684 = vpush %v1226_v18 }
 0x3bf   : > { %s1681_s29 = spop %1680 }
 0x3c0   : > { %v1034_v23 = vstv %s1681_s29  ;;  %s1683_s28 = spop %1682 }
 0x3c1   : > { %v2447_v8 = vmul.f32 %v1034_v23, %v1028_v20  ;;  %v2449_v25 = vmul.f32 %v1034_v23, %v1029_v21  ;;  %s1214_s30 = smul.f32 0.0025510204, %s1683_s28  ;;  %s1685_s27 = spop %1684  ;;  %v799_v20 = vmul.f32 %v2440_v54, %v756_v11  ;;  %v997_v21 = vld [vmem:[#allocation7 + $0x20] sm:$0xff] }
 0x3c2   : > { %s1228_s25 = smul.f32 0.0025510204, %s1685_s27 }
 0x3c3   : > { %s1229_s12 = smul.f32 %s1214_s30, %s1214_s30  ;;  %v1231_v42 = vstv %s1214_s30  ;;  %v1038_v10 = vmul.f32 %v2449_v25, %v995_v4  ;;  %v1037_v18 = vmul.f32 %v2447_v8, %v994_v5  ;;  %v534_v25 = vmul.f32 %v2416_v22, %v491_v19 }
 0x3c4   : > { %v1232_v43 = vsub.f32 %v2421_v27, %v1231_v42  ;;  %v1233_v44 = vsub.f32 %v2424_v26, %v1231_v42 }
 0x3c5   : > { %s1230_s18 = ssub.f32 %s1228_s25, %s1229_s12 }
 0x3c7   : > { %s1234_s26 = sadd.f32 1e-05, %s1230_s18 }
 0x3c9   : > { %v1235_v0 = vstv %s1234_s26  ;;  %s392_s26 = sand.u32 1, %s1970_s14  }
 0x3ca   : > { %v1338_v29 = vpop.xlane.xlu0 %1337  ;;  %1804 = vrsqrt.f32 %v1235_v0  ;;  %v759_v0 = vld [vmem:[#allocation7 + $0x18] sm:$0xff] }
 0x3cb   : > { %v1339_v30 = vrot.slane %v1338_v29, 4 }
 0x3cc   : > { %v1350_v51 = vpop.xlane.xlu1 %1349 }
 0x3cd   : > { %v1340_v31 = vadd.f32 %v1339_v30, %v1338_v29  ;;  %v1351_v53 = vrot.slane %v1350_v51, 4  ;;  %v798_v29 = vmul.f32 %v2438_v52, %v755_v15 }
 0x3cf   : > { %v1341_v32 = vrot.slane %v1340_v31, 2  ;;  %v1352_v33 = vadd.f32 %v1351_v53, %v1350_v51  ;;  %v535_v51 = vmul.f32 %v2418_v7, %v492_v17  ;;  %v1040_v53 = vadd.f32 %v1038_v10, %v998_v12  ;;  %v1385_v17 = vld [vmem:[%s2519_s5] sm:$0xff] }
 0x3d1   : > { %v1353_v34 = vrot.slane %v1352_v33, 2  ;;  %v1342_v2 = vadd.f32 %v1341_v32, %v1340_v31  ;;  %v758_v31 = vld [vmem:[#allocation7 + $0x10] sm:$0xff]  ;;  %v494_v32 = vld [vmem:[#allocation7 + $0x8] sm:$0xff] }
 0x3d2   : > { %v537_v54 = vadd.f32 %v535_v51, %v494_v32 }
 0x3d3   : > { %v1343_v35 = vrot.slane %v1342_v2, 1  ;;  %v1354_v36 = vadd.f32 %v1353_v34, %v1352_v33  ;;  %v1039_v33 = vadd.f32 %v1037_v18, %v997_v21  ;;  %v493_v34 = vld [vmem:[#allocation7] sm:$0xff] }
 0x3d4   : > { %v541_v7 = vmul.f32 0.70710677, %v537_v54 }
 0x3d5   : > { %v1355_v37 = vrot.slane %v1354_v36, 1  ;;  %v1344_v38 = vadd.f32 %v1343_v35, %v1342_v2  ;;  %v801_v2 = vadd.f32 %v799_v20, %v759_v0  ;;  %v800_v35 = vadd.f32 %v798_v29, %v758_v31 }
 0x3d7   : > { %v1356_v39 = vadd.f32 %v1355_v37, %v1354_v36  ;;  %v1805_v40 = vpop.eup %1804  ;;  %v1044_v37 = vmul.f32 0.70710677, %v1040_v53  ;;  %v804_v52 = vmul.f32 0.70710677, %v800_v35  ;;  %v803_v4 = vmul.f32 0.5, %v801_v2 }
 0x3d8   : > { %1686 = vpush %v1805_v40  ;;  %v805_v40 = vmul.f32 0.70710677, %v801_v2  ;;  %v802_v5 = vmul.f32 0.5, %v800_v35 }
 0x3d9   : > { %1688 = vpush %v1344_v38  ;;  %v536_v38 = vadd.f32 %v534_v25, %v493_v34 }
 0x3da   : > { %1690 = vpush %v1356_v39  ;;  %v1043_v39 = vmul.f32 0.70710677, %v1039_v33 }
 0x3db   : > { %v540_v41 = vmul.f32 0.70710677, %v536_v38 }
 0x409   : > { %s1687_s21 = spop %1686 }
 0x40a   : > { %v1238_v45 = vstv %s1687_s21  ;;  %s1689_s22 = spop %1688  ;;  %s1636_s21 = sshll.u32 %s392_s26, 4 }
 0x40b   : > { %v1239_v46 = vmul.f32 %v1238_v45, %v1232_v43  ;;  %v1240_v47 = vmul.f32 %v1238_v45, %v1233_v44  ;;  %s1346_s20 = smul.f32 0.125, %s1689_s22  ;;  %s1691_s11 = spop %1690 }
 0x40c   : > { %s1358_s29 = smul.f32 0.125, %s1691_s11  ;;  %s1663_s22 = sshll.u32 %s2085_s17, 8 }
 0x40d   : > { %s1359_s28 = smul.f32 %s1346_s20, %s1346_s20  ;;  %v1361_v55 = vstv %s1346_s20  ;;  %v1241_v14 = vmul.f32 %v1239_v46, %v1198_v3  ;;  %s394_s20 = scalar_lea.vmem [#allocation8], %s1636_s21 }
 0x40e   : > { %v1362_v27 = vsub.f32 %v2436_v49, %v1361_v55  ;;  %v1199_v49 = vld [vmem:[#allocation5 + $0x38] sm:$0xff]  ;;  %s2008_s17 = smov [#allocation8]  }
 0x40f   : > { %s1360_s27 = ssub.f32 %s1358_s29, %s1359_s28  ;;  %v1242_v9 = vmul.f32 %v1240_v47, %v1199_v49  ;;  %v1243_v30 = vadd.f32 %v1241_v14, %v1201_v16  ;;  %v538_v14 = vmul.f32 0.5, %v536_v38 }
 0x411   : > { %s1363_s25 = sadd.f32 1e-05, %s1360_s27  ;;  %v1244_v23 = vadd.f32 %v1242_v9, %v1202_v13  ;;  %v1247_v36 = vmul.f32 0.70710677, %v1243_v30  ;;  %v539_v13 = vmul.f32 0.5, %v537_v54 }
 0x413   : > { %v1364_v48 = vstv %s1363_s25  ;;  %v1248_v8 = vmul.f32 0.70710677, %v1244_v23 }
 0x414   : > { %1806 = vrsqrt.f32 %v1364_v48 }
 0x421   : > { %v1807_v50 = vpop.eup %1806 }
 0x422   : > { %1692 = vpush %v1807_v50 }
 0x453   : > { %s1693_s30 = spop %1692 }
 0x454   : > { %v1367_v26 = vstv %s1693_s30 }
 0x455   : > { %v1368_v6 = vmul.f32 %v1367_v26, %v1362_v27  ;;  %v1246_v26 = vmul.f32 0.5, %v1244_v23 }
 0x457   : > { %v1370_v28 = vmul.f32 %v1369_v56, %v1368_v6 }
 0x459   : > { %v1372_v58 = vadd.f32 %v1371_v57, %v1370_v28  ;;  %v1245_v57 = vmul.f32 0.5, %v1243_v30 }
 0x45b   : > { %v1374_v59 = vmul.f32 0.70710677, %v1372_v58  ;;  %v1373_v61 = vmul.f32 0.5, %v1372_v58 }
 0x45d   : > { %1808 = verf.f32 %v1374_v59 }
 0x45e   : > { %1810 = verf.f32 %v1248_v8 }
 0x45f   : > { %1812 = verf.f32 %v1247_v36 }
 0x460   : > { %1814 = verf.f32 %v1044_v37 }
 0x461   : > { %1816 = verf.f32 %v1043_v39 }
 0x462   : > { %1818 = verf.f32 %v805_v40 }
 0x463   : > { %1820 = verf.f32 %v804_v52 }
 0x464   : > { %1822 = verf.f32 %v541_v7 }
 0x465   : > { %1824 = verf.f32 %v540_v41  ;;  %v1462_v41 = vld [vmem:[#allocation5 + $0x40] sm:$0xff] }
 0x46a   : > { %v1809_v60 = vpop.eup %1808 }
 0x46b   : > { %v1376_v62 = vadd.f32 1.0, %v1809_v60  ;;  %v1811_v22 = vpop.eup %1810  ;;  %v1042_v60 = vmul.f32 0.5, %v1040_v53 }
 0x46c   : > { %v1813_v42 = vpop.eup %1812  ;;  %v1252_v45 = vadd.f32 1.0, %v1811_v22  ;;  %v1463_v22 = vld [vmem:[#allocation5 + $0x48] sm:$0xff] }
 0x46d   : > { %v1377_v63 = vmul.f32 %v1376_v62, %v1373_v61  ;;  %v1815_v43 = vpop.eup %1814  ;;  %v1251_v48 = vadd.f32 1.0, %v1813_v42  ;;  %v1041_v62 = vmul.f32 0.5, %v1039_v33 }
 0x46e   : > { %v1817_v44 = vpop.eup %1816  ;;  %v1048_v56 = vadd.f32 1.0, %v1815_v43  ;;  %v1254_v59 = vmul.f32 %v1252_v45, %v1246_v26  ;;  %v1465_v45 = vld [vmem:[#allocation7 + $0x40] sm:$0xff] }
 0x46f   : > { %1380 = vperm.xlu0 %1795, %v1377_v63   ;;  %v1819_v46 = vpop.eup %1818  ;;  %v1047_v28 = vadd.f32 1.0, %v1817_v44  ;;  %v1253_v63 = vmul.f32 %v1251_v48, %v1245_v57 }
 0x470   : > { %v1821_v50 = vpop.eup %1820  ;;  %v809_v61 = vadd.f32 1.0, %v1819_v46  ;;  %v1050_v3 = vmul.f32 %v1048_v56, %v1042_v60  ;;  %v1466_v46 = vld [vmem:[#allocation7 + $0x48] sm:$0xff] }
 0x471   : > { %v1823_v6 = vpop.eup %1822  ;;  %v808_v49 = vadd.f32 1.0, %v1821_v50 }
 0x472   : > { %v1825_v58 = vpop.eup %1824  ;;  %v811_v11 = vmul.f32 %v809_v61, %v803_v4 }
 0x473   : > { %v544_v9 = vadd.f32 1.0, %v1825_v58  ;;  %v810_v15 = vmul.f32 %v808_v49, %v802_v5 }
 0x475   : > { %v546_v16 = vmul.f32 %v544_v9, %v538_v14 }
 0x4ea   : > { %v1381_v47 = vpop.permute.xlu0 %1380 }
 0x4eb   : > { %v1383_v55 = vmul.f32 %v1381_v47, %v2376_v24  ;;  %v1384_v27 = vmul.f32 %v1381_v47, %v2378_v1  ;;  %v545_v24 = vadd.f32 1.0, %v1823_v6  ;;  %v1049_v1 = vmul.f32 %v1047_v28, %v1041_v62 }
 0x4ed   : > { %1412 = vmatprep.subr.mxu0 %v1384_v27  ;;  %v547_v10 = vmul.f32 %v545_v24, %v539_v13 }
 0x4ee   : > { %1413 = vmatpush1.msra.mxu0 %v1383_v55 }
 0x4ef   : > { %1414 = vmatprep.subr.mxu0 %v1254_v59 }
 0x4f0   : > { %1415 = vmatpush1.msra.mxu0 %v1253_v63 }
 0x4f1   : > { %1416 = vmatprep.subr.mxu0 %v1050_v3 }
 0x4f2   : > { %1417 = vmatpush1.msra.mxu0 %v1049_v1 }
 0x4f3   : > { %1418 = vmatprep.subr.mxu0 %v811_v11 }
 0x4f4   : > { %1419 = vmatpush1.msra.mxu0 %v810_v15 }
 0x4f5   : > { %1420 = vmatprep.subr.mxu0 %v547_v10 }
 0x4f6   : > { %1421 = vmatpush1.msra.mxu0 %v546_v16 }
 0x4f7   : > { %1656 = vmatmul.mubr.msk.f32.vlgmr.msra.gmra.mxu0 %vm1386_vm10, %v1385_v17 }
 0x5b7   : > { %v1456_v12 = vpop.f32.mrf.mxu0 }
 0x5b8   : > { %v1479_v0 = vmul.f32 %v1456_v12, %v1456_v12 }
 0x5b9   : > { %v1458_v18 = vpop.f32.mrf.mxu0 }
 0x5ba   : > { %v1467_v19 = vsel %vm495_vm1, %v1458_v18, 0.0  ;;  %v1480_v20 = vmul.f32 %v1458_v18, %v1458_v18 }
 0x5bb   : > { %v1468_v21 = vadd.f32 %v1467_v19, %v1456_v12 }
 0x5bc   : > { %v1481_v23 = vsel %vm495_vm1, %v1480_v20, 0.0 }
 0x5bd   : > { %1469 = vadd.xlane.f32.xlu1 %v1468_v21  ;;  %v1482_v29 = vadd.f32 %v1481_v23, %v1479_v0 }
 0x5c1   : > { %1483 = vadd.xlane.f32.xlu1 %v1482_v29 }
 0x646   : > { %v1470_v30 = vpop.xlane.xlu1 %1469 }
 0x647   : > { %v1471_v51 = vrot.slane %v1470_v30, 4 }
 0x649   : > { %v1472_v31 = vadd.f32 %v1471_v51, %v1470_v30 }
 0x64a   : > { %v1484_v53 = vpop.xlane.xlu1 %1483 }
 0x64b   : > { %v1473_v32 = vrot.slane %v1472_v31, 2  ;;  %v1485_v25 = vrot.slane %v1484_v53, 4 }
 0x64d   : > { %v1486_v33 = vadd.f32 %v1485_v25, %v1484_v53  ;;  %v1474_v34 = vadd.f32 %v1473_v32, %v1472_v31 }
 0x64f   : > { %v1487_v2 = vrot.slane %v1486_v33, 2  ;;  %v1475_v8 = vrot.slane %v1474_v34, 1 }
 0x651   : > { %v1488_v35 = vadd.f32 %v1487_v2, %v1486_v33  ;;  %v1476_v36 = vadd.f32 %v1475_v8, %v1474_v34 }
 0x653   : > { %1694 = vpush %v1476_v36  ;;  %v1489_v54 = vrot.slane %v1488_v35, 1 }
 0x655   : > { %v1490_v37 = vadd.f32 %v1489_v54, %v1488_v35 }
 0x657   : > { %1696 = vpush %v1490_v37 }
 0x684   : > { %s1695_s11 = spop %1694 }
 0x685   : > { %s1478_s29 = smul.f32 0.0025510204, %s1695_s11  ;;  %s1536_s11 = sshll.u32 %s394_s20, 4  ;;  %s1537_s11 = int_to_ptr.vmem [resolvable:$true] %s1536_s11 }
 0x687   : > { %s1493_s28 = smul.f32 %s1478_s29, %s1478_s29  ;;  %v1495_v40 = vstv %s1478_s29 }
 0x688   : > { %s1697_s27 = spop %1696  ;;  %v1496_v52 = vsub.f32 %v1456_v12, %v1495_v40  ;;  %v1497_v7 = vsub.f32 %v1458_v18, %v1495_v40 }
 0x689   : > { %s1492_s25 = smul.f32 0.0025510204, %s1697_s27  ;;  %s2478_s27 = scalar_lea.hbm %s2524_s10, %s1663_s22 }
 0x68b   : > { %s1494_s30 = ssub.f32 %s1492_s25, %s1493_s28  ;;  %s1522_s25 = scalar_lea.sflag [#allocation4], %s392_s26 }
 0x68d   : > { %s1498_s12 = sadd.f32 1e-05, %s1494_s30  ;;  %s1910_s30 = scalar_lea.vmem %s1537_s11, 256 }
 0x68e   : > { %p1911_p10 = scmp.ne.s32.totalorder %s1537_s11, %s1910_s30 }
 0x68f   : > { %v1499_v38 = vstv %s1498_s12  ;;  %s1914_s12 = sshll.u32 %s2008_s17, 4  ;;  %s1915_s12 = int_to_ptr.vmem [resolvable:$false] %s1914_s12 }
 0x690   : > { %1826 = vrsqrt.f32 %v1499_v38  ;;  %p1912_p2 = pnand %p1911_p10, %p2536_p12  ;;  %p1917_p7 = scmp.lt.s32.totalorder %s1537_s11, %s1915_s12 }
 0x692   : > { %p1913_p4 = pneg %p1912_p2 }
 0x69d   : > { %v1827_v39 = vpop.eup %1826 }
 0x69e   : > { %1698 = vpush %v1827_v39 }
 0x6cf   : > { %s1699_s18 = spop %1698 }
 0x6d0   : > { %v1502_v42 = vstv %s1699_s18  ;;  %s1916_s18 = scalar_lea.vmem %s1915_s12, 512 }
 0x6d1   : > { %v1503_v43 = vmul.f32 %v1502_v42, %v1496_v52  ;;  %v1504_v44 = vmul.f32 %v1502_v42, %v1497_v7  ;;  %p1918_p8 = scmp.lt.s32.totalorder %s1916_s18, %s1910_s30 }
 0x6d3   : > { %v1505_v47 = vmul.f32 %v1503_v43, %v1462_v41  ;;  %v1506_v48 = vmul.f32 %v1504_v44, %v1463_v22  ;;  %p1919_p11 = por %p1918_p8, %p1917_p7 }
 0x6d5   : > { %v1507_v50 = vadd.f32 %v1505_v47, %v1465_v45  ;;  %v1508_v55 = vadd.f32 %v1506_v48, %v1466_v46  ;;  %p1920_p0 = pnand %p1919_p11, %p1913_p4 }
 0x6d7   : > { %v1511_v27 = vmul.f32 0.70710677, %v1507_v50  ;;  %v1512_v26 = vmul.f32 0.70710677, %v1508_v55  ;;  %v1509_v57 = vmul.f32 0.5, %v1507_v50  ;;  %v1510_v58 = vmul.f32 0.5, %v1508_v55 }
 0x6d9   : > { %1828 = verf.f32 %v1511_v27 }
 0x6da   : > { %1830 = verf.f32 %v1512_v26 }
 0x6e6   : > { %v1829_v56 = vpop.eup %1828 }
 0x6e7   : > { %v1831_v6 = vpop.eup %1830  ;;  %v1515_v28 = vadd.f32 1.0, %v1829_v56 }
 0x6e8   : > { %v1516_v59 = vadd.f32 1.0, %v1831_v6 }
 0x6e9   : > { %v1517_v60 = vmul.f32 %v1515_v28, %v1509_v57 }
 0x6ea   : > { %v1518_v61 = vmul.f32 %v1516_v59, %v1510_v58 }
 0x6eb   : > { %1519 = vst [vmem:[%s394_s20] sm:$0xff] %v1517_v60 }
 0x6ec   : > { %1520 = vst.msk [vmem:[%s394_s20 + $0x8] sm:$0xff] %vm495_vm1, %v1518_v61 }
 0x6ed   : > { %1923 = shalt.err (!%p1920_p0)
}
 0x6ee   : > { %s1924_s21 = scalar_lea.hbm %s2478_s27, 256  ;;  %s1928_s20 = scalar_lea.hbm %s2524_s10, 512 }
 0x6ef   : > { %p1925_p6 = scmp.ne.s32.totalorder %s2478_s27, %s1924_s21  ;;  %p1929_p1 = scmp.lt.s32.totalorder %s2478_s27, %s2524_s10 }
 0x6f0   : > { %p1930_p5 = scmp.lt.s32.totalorder %s1928_s20, %s1924_s21 }
 0x6f1   : > { %p1926_p9 = pnand %p1925_p6, %p2536_p12 }
 0x6f2   : > { %p1931_p3 = por %p1930_p5, %p1929_p1 }
 0x6f3   : > { %p1927_p13 = pneg %p1926_p9 }
 0x6f5   : > { %p1932_p10 = pnand %p1931_p3, %p1927_p13 }
 0x6f7   : > { %1935 = shalt.err (!%p1932_p10)
}
 0x6f8   : > { %1712 = dma.vmem_to_hbm [thread:$0]  (%p2536_p12), %s1537_s11, 256, %s2478_s27, %s1522_s25  }
 0x6f9 PF: > { %p1734_p2 = scmp.ge.s32.totalorder %s1978_s16, 2  ;;  %s1548_s30 = sand.u32 1, %s1966_s13  }
 0x6fa   : > { %p2537_p4 = scmp.ne.s32.totalorder %s2529_s24, 0  ;;  %s1549_s17 = scalar_lea.sflag [#allocation4], %s1548_s30 }
 0x6fc   : > { %p1725_p7 = pnand %p1734_p2, %p2537_p4 }
 0x6fe   : > { %p1726_p8 = pneg %p1725_p7 }
 0x700   : > { %1961 = dma.done.wait (%p1726_p8), %s1549_s17, 256  }
 0x701   : > { %1963 = vsyncadd (%p1726_p8), %s1549_s17, 4294967040  ;;  %s2538_s12 = sld [smem:[#allocation12_spill]]  ;;  %p22_p11 = scmp.ge.s32.totalorder %s2089_s19, 4  }
 0x702   : > { %s2539_s13 = smov %s1970_s14  ;;  %s2540_s14 = smov %s1974_s15 }
 0x703   : > { %s2542_s16 = smov %s2089_s19  ;;  %24 = sbr.rel (!%p22_p11) target bundleno = 5 (0x5), region = 118 }
 0x707   : > { %s2541_s15 = smov %s2538_s12 }
 0x708   :  { %1554 = vsyncpa [#allocation3], 1 }
 0x709   :  { %1556 = vsyncpa [#allocation3 + $0x1], 1 }
 0x70a   :  { %1557 = vsyncpa [#allocation6], 1 }
 0x70b   :  { %1558 = vsyncpa [#allocation4], 1 }
 0x70c   :  { %1560 = vsyncpa [#allocation4 + $0x1], 1 }

</bundles_post_ra>
